<compile_context>
chip_gen: v6e
topology: v6e:2x2x1
jax: 0.10.0
libtpu: 0.0.40
codegen_flags: <defaults>
</compile_context>

<pallas_src>
import jax
import jax.numpy as jnp
from jax.experimental import pallas as pl
from jax.experimental.pallas import tpu as pltpu

F_IN = 1000
F_PAD = 1024  # 1000 padded up to a multiple of 128
LAYER_SIZES = [(F_IN, 512), (512, 512), (512, 256), (256, 128), (128, 7)]


def _round_up(x, m):
    return ((x + m - 1) // m) * m


def mlp_kernel(x_ref,
               w1_ref, b1_ref,
               w2_ref, b2_ref,
               w3_ref, b3_ref,
               w4_ref, b4_ref,
               w5_ref, b5_ref,
               out_ref):
    # Activations are cast to bf16 right before each MXU call; accumulation,
    # bias add, ReLU and softmax stay in f32 (v5e has no bf16 VPU/EUP).
    x = x_ref[...].astype(jnp.bfloat16)

    h = jnp.dot(x, w1_ref[...], preferred_element_type=jnp.float32)
    h = jnp.maximum(h + b1_ref[...], 0.0)

    h = jnp.dot(h.astype(jnp.bfloat16), w2_ref[...],
                preferred_element_type=jnp.float32)
    h = jnp.maximum(h + b2_ref[...], 0.0)

    h = jnp.dot(h.astype(jnp.bfloat16), w3_ref[...],
                preferred_element_type=jnp.float32)
    h = jnp.maximum(h + b3_ref[...], 0.0)

    h = jnp.dot(h.astype(jnp.bfloat16), w4_ref[...],
                preferred_element_type=jnp.float32)
    h = jnp.maximum(h + b4_ref[...], 0.0)

    logits = jnp.dot(h.astype(jnp.bfloat16), w5_ref[...],
                     preferred_element_type=jnp.float32) + b5_ref[...]

    # softmax over dim=1 (the 7 logits); divide via approx reciprocal (EUP).
    m = jnp.max(logits, axis=1, keepdims=True)
    e = jnp.exp(logits - m)
    denom = jnp.sum(e, axis=1, keepdims=True)
    out_ref[...] = e * pl.reciprocal(denom, approx=True)


def mlp_forward(x, params_f32):
    """x: (B, 1000) f32.  params_f32: list of (W_t (in,out) f32, b (1,out) f32)."""
    B, F = x.shape
    assert F == F_IN

    # --- host-side prep: pad K of layer 1 to 1024, cast weights to bf16 ------
    x = jnp.pad(x, ((0, 0), (0, F_PAD - F_IN)))

    prepped = []
    for li, (w, b) in enumerate(params_f32):
        if li == 0:
            w = jnp.pad(w, ((0, F_PAD - F_IN), (0, 0)))  # zero rows -> no effect
        prepped.append((w.astype(jnp.bfloat16), b.astype(jnp.float32)))

    # --- batch tiling: MXU-height tiles when B is large, minimal pad when tiny
    TB = 256 if B >= 256 else _round_up(B, 8)
    Bp = _round_up(B, TB)
    if Bp != B:
        x = jnp.pad(x, ((0, Bp - B), (0, 0)))
    grid = (Bp // TB,)

    flat_args = [x]
    in_specs = [pl.BlockSpec((TB, F_PAD), lambda i: (i, 0))]
    for w, b in prepped:
        flat_args += [w, b]
        # Constant index_map -> weights/biases stay resident across grid steps.
        in_specs.append(pl.BlockSpec(w.shape, lambda i: (0, 0)))
        in_specs.append(pl.BlockSpec(b.shape, lambda i: (0, 0)))

    out = pl.pallas_call(
        mlp_kernel,
        out_shape=jax.ShapeDtypeStruct((Bp, 7), jnp.float32),
        grid=grid,
        in_specs=in_specs,
        out_specs=pl.BlockSpec((TB, 7), lambda i: (i, 0)),
        compiler_params=pltpu.CompilerParams(
            dimension_semantics=("parallel",)),
    )(*flat_args)

    return out[:B].reshape(-1, 7)


def init_params(key):
    """Deterministic init matching nn.Linear shapes (out,in); returned as (in,out) f32."""
    params = []
    for fan_in, fan_out in LAYER_SIZES:
        kw, kb, key = jax.random.split(key, 3)
        bound = 1.0 / jnp.sqrt(fan_in)
        w_t = jax.random.uniform(kw, (fan_in, fan_out), jnp.float32, -bound, bound)
        b = jax.random.uniform(kb, (1, fan_out), jnp.float32, -bound, bound)
        params.append((w_t, b))
    return params


def reference_forward(x, params_f32):
    """Pure-JAX reference mirroring the kernel's bf16-input / f32-accumulate dots."""
    h = x
    n = len(params_f32)
    for i, (w, b) in enumerate(params_f32):
        h = jnp.dot(h.astype(jnp.bfloat16), w.astype(jnp.bfloat16),
                    preferred_element_type=jnp.float32) + b
        if i < n - 1:
            h = jnp.maximum(h, 0.0)
    return jax.nn.softmax(h, axis=1).reshape(-1, 7)


if __name__ == "__main__":
    key = jax.random.PRNGKey(0)
    kx, kp = jax.random.split(key)

    B = 8
    x = jax.random.normal(kx, (B, F_IN), jnp.float32)
    params = init_params(kp)

    out = mlp_forward(x, params)   # mirrors x.view(-1, 7); already (B, 7)
    jax.block_until_ready(out)

    ref = reference_forward(x, params)
    assert out.shape == (B, 7)
    # Tolerances account for bf16 matmul inputs + approx reciprocal in softmax.
    assert jnp.allclose(out, ref, atol=5e-3, rtol=5e-3), "mismatch vs reference"
    assert jnp.allclose(jnp.sum(out, axis=1), jnp.ones((B,)), atol=5e-3)

    print("KERNEL_OK")
</pallas_src>

<mosaic_0001>
module attributes {stable_mosaic.version = 11 : i64} {
  func.func @mlp_kernel(%arg0: i32, %arg1: memref<8x1024xf32, #tpu.memory_space<vmem>>, %arg2: memref<1024x512xbf16, #tpu.memory_space<vmem>>, %arg3: memref<1x512xf32, #tpu.memory_space<vmem>>, %arg4: memref<512x512xbf16, #tpu.memory_space<vmem>>, %arg5: memref<1x512xf32, #tpu.memory_space<vmem>>, %arg6: memref<512x256xbf16, #tpu.memory_space<vmem>>, %arg7: memref<1x256xf32, #tpu.memory_space<vmem>>, %arg8: memref<256x128xbf16, #tpu.memory_space<vmem>>, %arg9: memref<1x128xf32, #tpu.memory_space<vmem>>, %arg10: memref<128x7xbf16, #tpu.memory_space<vmem>>, %arg11: memref<1x7xf32, #tpu.memory_space<vmem>>, %arg12: memref<8x7xf32, #tpu.memory_space<vmem>>) attributes {dimension_semantics = [#tpu.dimension_semantics<parallel>], iteration_bounds = array<i64: 1>, scalar_prefetch = 0 : i64, scratch_operands = 0 : i64, tpu.core_type = #tpu.core_type<tc>, window_params = [{transform_indices = @transform_0, window_bounds = array<i64: 8, 1024>}, {pipeline_mode = #tpu.pipeline_mode<synchronous>, transform_indices = @transform_1, window_bounds = array<i64: 1024, 512>}, {pipeline_mode = #tpu.pipeline_mode<synchronous>, transform_indices = @transform_2, window_bounds = array<i64: 1, 512>}, {pipeline_mode = #tpu.pipeline_mode<synchronous>, transform_indices = @transform_3, window_bounds = array<i64: 512, 512>}, {pipeline_mode = #tpu.pipeline_mode<synchronous>, transform_indices = @transform_4, window_bounds = array<i64: 1, 512>}, {pipeline_mode = #tpu.pipeline_mode<synchronous>, transform_indices = @transform_5, window_bounds = array<i64: 512, 256>}, {pipeline_mode = #tpu.pipeline_mode<synchronous>, transform_indices = @transform_6, window_bounds = array<i64: 1, 256>}, {pipeline_mode = #tpu.pipeline_mode<synchronous>, transform_indices = @transform_7, window_bounds = array<i64: 256, 128>}, {pipeline_mode = #tpu.pipeline_mode<synchronous>, transform_indices = @transform_8, window_bounds = array<i64: 1, 128>}, {pipeline_mode = #tpu.pipeline_mode<synchronous>, transform_indices = @transform_9, window_bounds = array<i64: 128, 7>}, {pipeline_mode = #tpu.pipeline_mode<synchronous>, transform_indices = @transform_10, window_bounds = array<i64: 1, 7>}, {transform_indices = @transform_11, window_bounds = array<i64: 8, 7>}]} {
    %c0 = arith.constant 0 : index
    %c0_0 = arith.constant 0 : index
    %0 = vector.load %arg1[%c0, %c0_0] : memref<8x1024xf32, #tpu.memory_space<vmem>>, vector<8x1024xf32>
    %1 = arith.truncf %0 : vector<8x1024xf32> to vector<8x1024xbf16>
    %c0_1 = arith.constant 0 : index
    %c0_2 = arith.constant 0 : index
    %2 = vector.load %arg2[%c0_1, %c0_2] : memref<1024x512xbf16, #tpu.memory_space<vmem>>, vector<1024x512xbf16>
    %cst = arith.constant dense<0.000000e+00> : vector<8x512xf32>
    %3 = tpu.matmul %1, %2, %cst {dimension_numbers = #tpu.dot_dimension_numbers<[1], [0], [0], [1], [0, 0, 1, 1], [], []>} : vector<8x1024xbf16>, vector<1024x512xbf16>, vector<8x512xf32> -> vector<8x512xf32>
    %c0_3 = arith.constant 0 : index
    %c0_4 = arith.constant 0 : index
    %4 = vector.load %arg3[%c0_3, %c0_4] : memref<1x512xf32, #tpu.memory_space<vmem>>, vector<1x512xf32>
    %5 = vector.broadcast %4 : vector<1x512xf32> to vector<8x512xf32>
    %6 = arith.addf %3, %5 : vector<8x512xf32>
    %cst_5 = arith.constant 0.000000e+00 : f32
    %7 = vector.broadcast %cst_5 : f32 to vector<8x512xf32>
    %8 = arith.maximumf %6, %7 : vector<8x512xf32>
    %9 = arith.truncf %8 : vector<8x512xf32> to vector<8x512xbf16>
    %c0_6 = arith.constant 0 : index
    %c0_7 = arith.constant 0 : index
    %10 = vector.load %arg4[%c0_6, %c0_7] : memref<512x512xbf16, #tpu.memory_space<vmem>>, vector<512x512xbf16>
    %cst_8 = arith.constant dense<0.000000e+00> : vector<8x512xf32>
    %11 = tpu.matmul %9, %10, %cst_8 {dimension_numbers = #tpu.dot_dimension_numbers<[1], [0], [0], [1], [0, 0, 1, 1], [], []>} : vector<8x512xbf16>, vector<512x512xbf16>, vector<8x512xf32> -> vector<8x512xf32>
    %c0_9 = arith.constant 0 : index
    %c0_10 = arith.constant 0 : index
    %12 = vector.load %arg5[%c0_9, %c0_10] : memref<1x512xf32, #tpu.memory_space<vmem>>, vector<1x512xf32>
    %13 = vector.broadcast %12 : vector<1x512xf32> to vector<8x512xf32>
    %14 = arith.addf %11, %13 : vector<8x512xf32>
    %cst_11 = arith.constant 0.000000e+00 : f32
    %15 = vector.broadcast %cst_11 : f32 to vector<8x512xf32>
    %16 = arith.maximumf %14, %15 : vector<8x512xf32>
    %17 = arith.truncf %16 : vector<8x512xf32> to vector<8x512xbf16>
    %c0_12 = arith.constant 0 : index
    %c0_13 = arith.constant 0 : index
    %18 = vector.load %arg6[%c0_12, %c0_13] : memref<512x256xbf16, #tpu.memory_space<vmem>>, vector<512x256xbf16>
    %cst_14 = arith.constant dense<0.000000e+00> : vector<8x256xf32>
    %19 = tpu.matmul %17, %18, %cst_14 {dimension_numbers = #tpu.dot_dimension_numbers<[1], [0], [0], [1], [0, 0, 1, 1], [], []>} : vector<8x512xbf16>, vector<512x256xbf16>, vector<8x256xf32> -> vector<8x256xf32>
    %c0_15 = arith.constant 0 : index
    %c0_16 = arith.constant 0 : index
    %20 = vector.load %arg7[%c0_15, %c0_16] : memref<1x256xf32, #tpu.memory_space<vmem>>, vector<1x256xf32>
    %21 = vector.broadcast %20 : vector<1x256xf32> to vector<8x256xf32>
    %22 = arith.addf %19, %21 : vector<8x256xf32>
    %cst_17 = arith.constant 0.000000e+00 : f32
    %23 = vector.broadcast %cst_17 : f32 to vector<8x256xf32>
    %24 = arith.maximumf %22, %23 : vector<8x256xf32>
    %25 = arith.truncf %24 : vector<8x256xf32> to vector<8x256xbf16>
    %c0_18 = arith.constant 0 : index
    %c0_19 = arith.constant 0 : index
    %26 = vector.load %arg8[%c0_18, %c0_19] : memref<256x128xbf16, #tpu.memory_space<vmem>>, vector<256x128xbf16>
    %cst_20 = arith.constant dense<0.000000e+00> : vector<8x128xf32>
    %27 = tpu.matmul %25, %26, %cst_20 {dimension_numbers = #tpu.dot_dimension_numbers<[1], [0], [0], [1], [0, 0, 1, 1], [], []>} : vector<8x256xbf16>, vector<256x128xbf16>, vector<8x128xf32> -> vector<8x128xf32>
    %c0_21 = arith.constant 0 : index
    %c0_22 = arith.constant 0 : index
    %28 = vector.load %arg9[%c0_21, %c0_22] : memref<1x128xf32, #tpu.memory_space<vmem>>, vector<1x128xf32>
    %29 = vector.broadcast %28 : vector<1x128xf32> to vector<8x128xf32>
    %30 = arith.addf %27, %29 : vector<8x128xf32>
    %cst_23 = arith.constant 0.000000e+00 : f32
    %31 = vector.broadcast %cst_23 : f32 to vector<8x128xf32>
    %32 = arith.maximumf %30, %31 : vector<8x128xf32>
    %33 = arith.truncf %32 : vector<8x128xf32> to vector<8x128xbf16>
    %c0_24 = arith.constant 0 : index
    %c0_25 = arith.constant 0 : index
    %34 = vector.load %arg10[%c0_24, %c0_25] : memref<128x7xbf16, #tpu.memory_space<vmem>>, vector<128x7xbf16>
    %cst_26 = arith.constant dense<0.000000e+00> : vector<8x7xf32>
    %35 = tpu.matmul %33, %34, %cst_26 {dimension_numbers = #tpu.dot_dimension_numbers<[1], [0], [0], [1], [0, 0, 1, 1], [], []>} : vector<8x128xbf16>, vector<128x7xbf16>, vector<8x7xf32> -> vector<8x7xf32>
    %c0_27 = arith.constant 0 : index
    %c0_28 = arith.constant 0 : index
    %36 = vector.load %arg11[%c0_27, %c0_28] : memref<1x7xf32, #tpu.memory_space<vmem>>, vector<1x7xf32>
    %37 = vector.broadcast %36 : vector<1x7xf32> to vector<8x7xf32>
    %38 = arith.addf %35, %37 : vector<8x7xf32>
    %cst_29 = arith.constant dense<0xFF800000> : vector<8xf32>
    %39 = vector.multi_reduction <maximumf>, %38, %cst_29 [1] : vector<8x7xf32> to vector<8xf32>
    %40 = vector.shape_cast %39 : vector<8xf32> to vector<8x1xf32>
    %41 = vector.broadcast %40 : vector<8x1xf32> to vector<8x7xf32>
    %42 = arith.subf %38, %41 : vector<8x7xf32>
    %43 = math.exp %42 : vector<8x7xf32>
    %cst_30 = arith.constant dense<0.000000e+00> : vector<8xf32>
    %44 = vector.multi_reduction <add>, %43, %cst_30 [1] : vector<8x7xf32> to vector<8xf32>
    %45 = vector.shape_cast %44 : vector<8xf32> to vector<8x1xf32>
    %46 = tpu.reciprocal %45 {approx = true} : vector<8x1xf32> -> vector<8x1xf32>
    %47 = vector.broadcast %46 : vector<8x1xf32> to vector<8x7xf32>
    %48 = arith.mulf %43, %47 : vector<8x7xf32>
    %c0_31 = arith.constant 0 : index
    %c0_32 = arith.constant 0 : index
    %49 = vector.load %arg12[%c0_31, %c0_32] : memref<8x7xf32, #tpu.memory_space<vmem>>, vector<8x7xf32>
    tpu.vector_store %arg12[%c0_31, %c0_32], %48 {strides = array<i32>} : memref<8x7xf32, #tpu.memory_space<vmem>>, vector<8x7xf32>,
    return
  }
  func.func @transform_0(%arg0: i32) -> (i32, i32) {
    %c0_i32 = arith.constant 0 : i32
    %c0_i32_0 = arith.constant 0 : i32
    return %arg0, %c0_i32 : i32, i32
  }
  func.func @transform_1(%arg0: i32) -> (i32, i32) {
    %c0_i32 = arith.constant 0 : i32
    %c0_i32_0 = arith.constant 0 : i32
    %c0_i32_1 = arith.constant 0 : i32
    return %c0_i32, %c0_i32_0 : i32, i32
  }
  func.func @transform_2(%arg0: i32) -> (i32, i32) {
    %c0_i32 = arith.constant 0 : i32
    %c0_i32_0 = arith.constant 0 : i32
    %c0_i32_1 = arith.constant 0 : i32
    return %c0_i32, %c0_i32_0 : i32, i32
  }
  func.func @transform_3(%arg0: i32) -> (i32, i32) {
    %c0_i32 = arith.constant 0 : i32
    %c0_i32_0 = arith.constant 0 : i32
    %c0_i32_1 = arith.constant 0 : i32
    return %c0_i32, %c0_i32_0 : i32, i32
  }
  func.func @transform_4(%arg0: i32) -> (i32, i32) {
    %c0_i32 = arith.constant 0 : i32
    %c0_i32_0 = arith.constant 0 : i32
    %c0_i32_1 = arith.constant 0 : i32
    return %c0_i32, %c0_i32_0 : i32, i32
  }
  func.func @transform_5(%arg0: i32) -> (i32, i32) {
    %c0_i32 = arith.constant 0 : i32
    %c0_i32_0 = arith.constant 0 : i32
    %c0_i32_1 = arith.constant 0 : i32
    return %c0_i32, %c0_i32_0 : i32, i32
  }
  func.func @transform_6(%arg0: i32) -> (i32, i32) {
    %c0_i32 = arith.constant 0 : i32
    %c0_i32_0 = arith.constant 0 : i32
    %c0_i32_1 = arith.constant 0 : i32
    return %c0_i32, %c0_i32_0 : i32, i32
  }
  func.func @transform_7(%arg0: i32) -> (i32, i32) {
    %c0_i32 = arith.constant 0 : i32
    %c0_i32_0 = arith.constant 0 : i32
    %c0_i32_1 = arith.constant 0 : i32
    return %c0_i32, %c0_i32_0 : i32, i32
  }
  func.func @transform_8(%arg0: i32) -> (i32, i32) {
    %c0_i32 = arith.constant 0 : i32
    %c0_i32_0 = arith.constant 0 : i32
    %c0_i32_1 = arith.constant 0 : i32
    return %c0_i32, %c0_i32_0 : i32, i32
  }
  func.func @transform_9(%arg0: i32) -> (i32, i32) {
    %c0_i32 = arith.constant 0 : i32
    %c0_i32_0 = arith.constant 0 : i32
    %c0_i32_1 = arith.constant 0 : i32
    return %c0_i32, %c0_i32_0 : i32, i32
  }
  func.func @transform_10(%arg0: i32) -> (i32, i32) {
    %c0_i32 = arith.constant 0 : i32
    %c0_i32_0 = arith.constant 0 : i32
    %c0_i32_1 = arith.constant 0 : i32
    return %c0_i32, %c0_i32_0 : i32, i32
  }
  func.func @transform_11(%arg0: i32) -> (i32, i32) {
    %c0_i32 = arith.constant 0 : i32
    %c0_i32_0 = arith.constant 0 : i32
    return %arg0, %c0_i32 : i32, i32
  }
}

</mosaic_0001>

<bundles_post_ra>
// kernel: tpu_custom_call.1
= control target key start
LH: loop header
LB: loop body
LE: loop exit
PB: predicated region body
PF: predicated region fallthrough
CT: control target
= control target key end

     0   :  { %16 = vsyncpa [#allocation3], 0  ;;  %s5355_s0 = inlined_call_operand.vmem [shape: f32[8,1024], index: 0, kind: input, shape index: {}]   ;;  %s5356_s1 = inlined_call_operand.hbm [shape: bf16[1024,512], index: 1, kind: input, shape index: {}]   ;;  %s5357_s2 = inlined_call_operand.vmem [shape: f32[1,512], index: 2, kind: input, shape index: {}]   ;;  %s5358_s3 = inlined_call_operand.hbm [shape: bf16[512,512], index: 3, kind: input, shape index: {}]   ;;  %s5359_s4 = inlined_call_operand.vmem [shape: f32[1,512], index: 4, kind: input, shape index: {}]   ;;  %s5360_s5 = inlined_call_operand.hbm [shape: bf16[512,256], index: 5, kind: input, shape index: {}]   ;;  %s5361_s6 = inlined_call_operand.vmem [shape: f32[1,256], index: 6, kind: input, shape index: {}]   ;;  %s5362_s7 = inlined_call_operand.hbm [shape: bf16[256,128], index: 7, kind: input, shape index: {}]   ;;  %s5363_s8 = inlined_call_operand.vmem [shape: f32[1,128], index: 8, kind: input, shape index: {}]   ;;  %s5364_s9 = inlined_call_operand.vmem [shape: bf16[128,7], index: 9, kind: input, shape index: {}]   ;;  %s5365_s10 = inlined_call_operand.vmem [shape: f32[1,7], index: 10, kind: input, shape index: {}]   ;;  %s5366_s11 = inlined_call_operand.hbm [shape: f32[8,7], index: 11, kind: output, shape index: {}]  }
   0x1   :  { %17 = vsyncpa [#allocation6], 0 }
   0x2   :  { %18 = vsyncpa [#allocation9], 0 }
   0x3   :  { %19 = vsyncpa [#allocation4], 0  ;;  %s5113_s17 = smov [#allocation5]   ;;  %s5114_s19 = smov [#allocation2]  }
   0x4   :  { %s41_s18 = sshll.u32 %s5113_s17, 4  ;;  %s27_s20 = sshll.u32 %s5114_s19, 4  ;;  %s42_s18 = int_to_ptr.vmem [resolvable:$true] %s41_s18  ;;  %s28_s20 = int_to_ptr.vmem [resolvable:$true] %s27_s20 }
   0x5   :  { %s5013_s21 = scalar_lea.vmem %s42_s18, 16384  ;;  %p5018_p1 = scmp.lt.s32.totalorder %s42_s18, %s42_s18 }
   0x6   :  { %p5014_p0 = scmp.ne.s32.totalorder %s42_s18, %s5013_s21  ;;  %p5019_p2 = scmp.lt.s32.totalorder %s5013_s21, %s5013_s21 }
   0x8   :  { %p5020_p3 = por %p5019_p2, %p5018_p1 }
   0xa   :  { %p5021_p4 = pnand %p5020_p3, %p5014_p0 }
   0xc   :  { %5024 = shalt.err (!%p5021_p4)
}
   0xd   :  { %s5115_s22 = smov 256   ;;  %s5116_s23 = smov 16  }
   0xe   :  { %47 = dma.hbm_to_vmem [thread:$0]  %s5358_s3, 16384, %s42_s18, [#allocation6], %s5115_s22, %s5115_s22, %s5116_s23  }
   0xf   :  { %s5033_s26 = scalar_lea.vmem %s28_s20, 32768  ;;  %p5038_p6 = scmp.lt.s32.totalorder %s28_s20, %s28_s20 }
  0x10   :  { %p5034_p5 = scmp.ne.s32.totalorder %s28_s20, %s5033_s26  ;;  %p5039_p7 = scmp.lt.s32.totalorder %s5033_s26, %s5033_s26 }
  0x12   :  { %p5040_p8 = por %p5039_p7, %p5038_p6 }
  0x14   :  { %p5041_p9 = pnand %p5040_p8, %p5034_p5 }
  0x16   :  { %5044 = shalt.err (!%p5041_p9)
}
  0x17   :  { %33 = dma.hbm_to_vmem [thread:$0]  %s5356_s1, 32768, %s28_s20, [#allocation3], %s5115_s22, %s5115_s22, %s5116_s23  }
  0x18   :  { %s5117_s29 = smov [#allocation7]  }
  0x19   :  { %s55_s30 = sshll.u32 %s5117_s29, 4  ;;  %s56_s30 = int_to_ptr.vmem [resolvable:$true] %s55_s30 }
  0x1a   :  { %s5053_s12 = scalar_lea.vmem %s56_s30, 8192  ;;  %p5058_p11 = scmp.lt.s32.totalorder %s56_s30, %s56_s30 }
  0x1b   :  { %p5054_p10 = scmp.ne.s32.totalorder %s56_s30, %s5053_s12  ;;  %p5059_p12 = scmp.lt.s32.totalorder %s5053_s12, %s5053_s12 }
  0x1d   :  { %p5060_p13 = por %p5059_p12, %p5058_p11 }
  0x1f   :  { %p5061_p0 = pnand %p5060_p13, %p5054_p10 }
  0x21   :  { %5064 = shalt.err (!%p5061_p0)
}
  0x22   :  { %s5118_s3 = smov 128   ;;  %s5119_s13 = smov 8  }
  0x23   :  { %61 = dma.hbm_to_vmem [thread:$0]  %s5360_s5, 8192, %s56_s30, [#allocation6], %s5118_s3, %s5118_s3, %s5119_s13  }
  0x24   :  { %s5120_s16 = smov [#allocation8]  }
  0x25   :  { %s69_s17 = sshll.u32 %s5120_s16, 4  ;;  %s70_s17 = int_to_ptr.vmem [resolvable:$true] %s69_s17 }
  0x26   :  { %s5073_s1 = scalar_lea.vmem %s70_s17, 2048  ;;  %p5078_p2 = scmp.lt.s32.totalorder %s70_s17, %s70_s17 }
  0x27   :  { %p5074_p1 = scmp.ne.s32.totalorder %s70_s17, %s5073_s1  ;;  %p5079_p3 = scmp.lt.s32.totalorder %s5073_s1, %s5073_s1 }
  0x29   :  { %p5080_p4 = por %p5079_p3, %p5078_p2 }
  0x2b   :  { %p5081_p5 = pnand %p5080_p4, %p5074_p1 }
  0x2d   :  { %5084 = shalt.err (!%p5081_p5)
}
  0x2e   :  { %s5121_s18 = smov 64   ;;  %s5122_s19 = smov 4  }
  0x2f   :  { %75 = dma.hbm_to_vmem [thread:$0]  %s5362_s7, 2048, %s70_s17, [#allocation9], %s5121_s18, %s5121_s18, %s5122_s19  }
  0x30   :  { %5105 = dma.done.wait [#allocation3], 32768  }
  0x31   :  { %5106 = vsyncadd [#allocation3], 4294934528 }
  0x32   :  { %5107 = dma.done.wait [#allocation6], 24576  }
  0x33   :  { %5108 = vsyncadd [#allocation6], 4294942720 }
  0x34   :  { %5109 = dma.done.wait [#allocation9], 2048  }
  0x35   :  { %5110 = vsyncadd [#allocation9], 4294965248  ;;  %v4305_v0 = vld [vmem:[#allocation2 + $0xe4] ss:$16 sps:$4 sm:$0xff]   ;;  %v4309_v2 = vld [vmem:[#allocation2 + $0xe0] ss:$16 sps:$4 sm:$0xff]  }
  0x36   :  { %v4307_v1 = vld [vmem:[#allocation2 + $0x2e4] ss:$16 sps:$4 sm:$0xff]   ;;  %1669 = vmatprep.subr.bf16.mxu0 %v4305_v0  ;;  %v4310_v3 = vld [vmem:[#allocation2 + $0x2e0] ss:$16 sps:$4 sm:$0xff]   ;;  %v96_v46 = vld [vmem:[%s5355_s0 + $0x8] sm:$0xff]  ;;  %vm5124_vm0 = vmmov 0  }
  0x37   :  { %1710 = vmatprep.subr.bf16.mxu1 %v4307_v1  ;;  %v4311_v4 = vld [vmem:[#allocation2 + $0xc4] ss:$16 sps:$4 sm:$0xff]   ;;  %1670 = vmatpush1.bf16.msra.mxu0 %v4309_v2  ;;  %v4315_v6 = vld [vmem:[#allocation2 + $0xc0] ss:$16 sps:$4 sm:$0xff]   ;;  %v5201_v49 = vpack.c.bf16 %v96_v46, %v96_v46  ;;  %v98_v50 = vld [vmem:[%s5355_s0 + $0x18] sm:$0xff]  ;;  %vm3737_vm1 = vcmask 56320  }
  0x38   :  { %1711 = vmatpush1.bf16.msra.mxu1 %v4310_v3  ;;  %v4313_v5 = vld [vmem:[#allocation2 + $0x2c4] ss:$16 sps:$4 sm:$0xff]   ;;  %1671 = vmatprep.subr.bf16.mxu0 %v4311_v4  ;;  %v4316_v7 = vld [vmem:[#allocation2 + $0x2c0] ss:$16 sps:$4 sm:$0xff]   ;;  %v5206_v52 = vpack.c.bf16 %v98_v50, %v98_v50 }
  0x39   :  { %1712 = vmatprep.subr.bf16.mxu1 %v4313_v5  ;;  %v4317_v8 = vld [vmem:[#allocation2 + $0xa4] ss:$16 sps:$4 sm:$0xff]   ;;  %v4321_v10 = vld [vmem:[#allocation2 + $0xa0] ss:$16 sps:$4 sm:$0xff]   ;;  %1701 = vmatprep.mubr.bf16.mxu0 %v5201_v49 }
  0x3a   :  { %v4319_v9 = vld [vmem:[#allocation2 + $0x2a4] ss:$16 sps:$4 sm:$0xff]   ;;  %v4322_v11 = vld [vmem:[#allocation2 + $0x2a0] ss:$16 sps:$4 sm:$0xff]   ;;  %1742 = vmatprep.mubr.bf16.mxu1 %v5206_v52 }
  0x3b   :  { %1672 = vmatpush1.bf16.msra.mxu0 %v4315_v6  ;;  %v4323_v12 = vld [vmem:[#allocation2 + $0x84] ss:$16 sps:$4 sm:$0xff]   ;;  %v4327_v14 = vld [vmem:[#allocation2 + $0x80] ss:$16 sps:$4 sm:$0xff]  }
  0x3c   :  { %1713 = vmatpush1.bf16.msra.mxu1 %v4316_v7  ;;  %1673 = vmatprep.subr.bf16.mxu0 %v4317_v8  ;;  %v4325_v13 = vld [vmem:[#allocation2 + $0x284] ss:$16 sps:$4 sm:$0xff]   ;;  %v4328_v15 = vld [vmem:[#allocation2 + $0x280] ss:$16 sps:$4 sm:$0xff]  }
  0x3d   :  { %1714 = vmatprep.subr.bf16.mxu1 %v4319_v9  ;;  %v4329_v16 = vld [vmem:[#allocation2 + $0x64] ss:$16 sps:$4 sm:$0xff]   ;;  %v4333_v18 = vld [vmem:[#allocation2 + $0x60] ss:$16 sps:$4 sm:$0xff]  }
  0x3e   :  { %v4331_v17 = vld [vmem:[#allocation2 + $0x264] ss:$16 sps:$4 sm:$0xff]   ;;  %v4334_v19 = vld [vmem:[#allocation2 + $0x260] ss:$16 sps:$4 sm:$0xff]  }
  0x3f   :  { %1674 = vmatpush1.bf16.msra.mxu0 %v4321_v10  ;;  %v4335_v20 = vld [vmem:[#allocation2 + $0x44] ss:$16 sps:$4 sm:$0xff]   ;;  %v4339_v22 = vld [vmem:[#allocation2 + $0x40] ss:$16 sps:$4 sm:$0xff]  }
  0x40   :  { %1715 = vmatpush1.bf16.msra.mxu1 %v4322_v11  ;;  %1675 = vmatprep.subr.bf16.mxu0 %v4323_v12  ;;  %v4337_v21 = vld [vmem:[#allocation2 + $0x244] ss:$16 sps:$4 sm:$0xff]   ;;  %v4340_v23 = vld [vmem:[#allocation2 + $0x240] ss:$16 sps:$4 sm:$0xff]  }
  0x41   :  { %1716 = vmatprep.subr.bf16.mxu1 %v4325_v13  ;;  %v4341_v24 = vld [vmem:[#allocation2 + $0x24] ss:$16 sps:$4 sm:$0xff]   ;;  %v4345_v26 = vld [vmem:[#allocation2 + $0x20] ss:$16 sps:$4 sm:$0xff]  }
  0x42   :  { %v4343_v25 = vld [vmem:[#allocation2 + $0x224] ss:$16 sps:$4 sm:$0xff]   ;;  %v4346_v27 = vld [vmem:[#allocation2 + $0x220] ss:$16 sps:$4 sm:$0xff]  }
  0x43   :  { %1676 = vmatpush1.bf16.msra.mxu0 %v4327_v14  ;;  %v4347_v28 = vld [vmem:[#allocation2 + $0x4] ss:$16 sps:$4 sm:$0xff]   ;;  %v4351_v30 = vld [vmem:[#allocation2] ss:$16 sps:$4 sm:$0xff]  }
  0x44   :  { %1717 = vmatpush1.bf16.msra.mxu1 %v4328_v15  ;;  %1677 = vmatprep.subr.bf16.mxu0 %v4329_v16  ;;  %v4349_v29 = vld [vmem:[#allocation2 + $0x204] ss:$16 sps:$4 sm:$0xff]   ;;  %v4352_v31 = vld [vmem:[#allocation2 + $0x200] ss:$16 sps:$4 sm:$0xff]  }
  0x45   :  { %1718 = vmatprep.subr.bf16.mxu1 %v4331_v17  ;;  %v4353_v32 = vld [vmem:[#allocation2 + $0x1e4] ss:$16 sps:$4 sm:$0xff]   ;;  %v4357_v34 = vld [vmem:[#allocation2 + $0x1e0] ss:$16 sps:$4 sm:$0xff]  }
  0x46   :  { %v4355_v33 = vld [vmem:[#allocation2 + $0x3e4] ss:$16 sps:$4 sm:$0xff]   ;;  %v4358_v35 = vld [vmem:[#allocation2 + $0x3e0] ss:$16 sps:$4 sm:$0xff]  }
  0x47   :  { %1678 = vmatpush1.bf16.msra.mxu0 %v4333_v18  ;;  %v4359_v36 = vld [vmem:[#allocation2 + $0x1c4] ss:$16 sps:$4 sm:$0xff]   ;;  %v4363_v38 = vld [vmem:[#allocation2 + $0x1c0] ss:$16 sps:$4 sm:$0xff]  }
  0x48   :  { %1719 = vmatpush1.bf16.msra.mxu1 %v4334_v19  ;;  %1679 = vmatprep.subr.bf16.mxu0 %v4335_v20  ;;  %v4361_v37 = vld [vmem:[#allocation2 + $0x3c4] ss:$16 sps:$4 sm:$0xff]   ;;  %v4364_v39 = vld [vmem:[#allocation2 + $0x3c0] ss:$16 sps:$4 sm:$0xff]  }
  0x49   :  { %1720 = vmatprep.subr.bf16.mxu1 %v4337_v21  ;;  %v4365_v40 = vld [vmem:[#allocation2 + $0x1a4] ss:$16 sps:$4 sm:$0xff]   ;;  %v4369_v42 = vld [vmem:[#allocation2 + $0x1a0] ss:$16 sps:$4 sm:$0xff]  }
  0x4a   :  { %v4367_v41 = vld [vmem:[#allocation2 + $0x3a4] ss:$16 sps:$4 sm:$0xff]   ;;  %v4370_v43 = vld [vmem:[#allocation2 + $0x3a0] ss:$16 sps:$4 sm:$0xff]  }
  0x4b   :  { %1680 = vmatpush1.bf16.msra.mxu0 %v4339_v22  ;;  %v4371_v44 = vld [vmem:[#allocation2 + $0x184] ss:$16 sps:$4 sm:$0xff]   ;;  %v4375_v47 = vld [vmem:[#allocation2 + $0x180] ss:$16 sps:$4 sm:$0xff]  }
  0x4c   :  { %1721 = vmatpush1.bf16.msra.mxu1 %v4340_v23  ;;  %1681 = vmatprep.subr.bf16.mxu0 %v4341_v24  ;;  %v4373_v45 = vld [vmem:[#allocation2 + $0x384] ss:$16 sps:$4 sm:$0xff]   ;;  %v4376_v48 = vld [vmem:[#allocation2 + $0x380] ss:$16 sps:$4 sm:$0xff]  }
  0x4d   :  { %1722 = vmatprep.subr.bf16.mxu1 %v4343_v25  ;;  %v4377_v51 = vld [vmem:[#allocation2 + $0x164] ss:$16 sps:$4 sm:$0xff]   ;;  %v4381_v54 = vld [vmem:[#allocation2 + $0x160] ss:$16 sps:$4 sm:$0xff]  }
  0x4e   :  { %v4379_v53 = vld [vmem:[#allocation2 + $0x364] ss:$16 sps:$4 sm:$0xff]   ;;  %v4382_v55 = vld [vmem:[#allocation2 + $0x360] ss:$16 sps:$4 sm:$0xff]  }
  0x4f   :  { %1682 = vmatpush1.bf16.msra.mxu0 %v4345_v26  ;;  %v4383_v56 = vld [vmem:[#allocation2 + $0x144] ss:$16 sps:$4 sm:$0xff]   ;;  %v4387_v58 = vld [vmem:[#allocation2 + $0x140] ss:$16 sps:$4 sm:$0xff]  }
  0x50   :  { %1723 = vmatpush1.bf16.msra.mxu1 %v4346_v27  ;;  %1683 = vmatprep.subr.bf16.mxu0 %v4347_v28  ;;  %v4385_v57 = vld [vmem:[#allocation2 + $0x344] ss:$16 sps:$4 sm:$0xff]   ;;  %v4388_v59 = vld [vmem:[#allocation2 + $0x340] ss:$16 sps:$4 sm:$0xff]  }
  0x51   :  { %1724 = vmatprep.subr.bf16.mxu1 %v4349_v29  ;;  %v4389_v60 = vld [vmem:[#allocation2 + $0x124] ss:$16 sps:$4 sm:$0xff]   ;;  %v4393_v62 = vld [vmem:[#allocation2 + $0x120] ss:$16 sps:$4 sm:$0xff]  }
  0x52   :  { %v4391_v61 = vld [vmem:[#allocation2 + $0x324] ss:$16 sps:$4 sm:$0xff]   ;;  %v4394_v63 = vld [vmem:[#allocation2 + $0x320] ss:$16 sps:$4 sm:$0xff]  }
  0x53   :  { %1684 = vmatpush1.bf16.msra.mxu0 %v4351_v30  ;;  %v4395_v0 = vld [vmem:[#allocation2 + $0x104] ss:$16 sps:$4 sm:$0xff]   ;;  %v4399_v2 = vld [vmem:[#allocation2 + $0x100] ss:$16 sps:$4 sm:$0xff]  }
  0x54   :  { %1725 = vmatpush1.bf16.msra.mxu1 %v4352_v31  ;;  %1685 = vmatprep.subr.bf16.mxu0 %v4353_v32  ;;  %v4397_v1 = vld [vmem:[#allocation2 + $0x304] ss:$16 sps:$4 sm:$0xff]   ;;  %v4400_v3 = vld [vmem:[#allocation2 + $0x300] ss:$16 sps:$4 sm:$0xff]  }
  0x55   :  { %1726 = vmatprep.subr.bf16.mxu1 %v4355_v33  ;;  %v95_v4 = vld [vmem:[%s5355_s0] sm:$0xff]  ;;  %v97_v5 = vld [vmem:[%s5355_s0 + $0x10] sm:$0xff] }
  0x56   :  { %v4403_v6 = vld [vmem:[#allocation2 + $0x4e4] ss:$16 sps:$4 sm:$0xff]   ;;  %v5216_v8 = vpack.c.bf16 %v95_v4, %v95_v4  ;;  %v5218_v9 = vpack.c.bf16 %v97_v5, %v97_v5  ;;  %v4401_v10 = vld [vmem:[#allocation2 + $0x4e0] ss:$16 sps:$4 sm:$0xff]  }
  0x57   :  { %1686 = vmatpush2.bf16.msra.mxu0 %v4357_v34  ;;  %v4406_v7 = vld [vmem:[#allocation2 + $0x6e4] ss:$16 sps:$4 sm:$0xff]   ;;  %v4404_v11 = vld [vmem:[#allocation2 + $0x6e0] ss:$16 sps:$4 sm:$0xff]   ;;  %v100_v34 = vld [vmem:[%s5355_s0 + $0x28] sm:$0xff] }
  0x58   :  { %1727 = vmatpush2.bf16.msra.mxu1 %v4358_v35  ;;  %1687 = vmatprep.subr.bf16.mxu0 %v4359_v36  ;;  %v4409_v12 = vld [vmem:[#allocation2 + $0x4c4] ss:$16 sps:$4 sm:$0xff]   ;;  %v4407_v14 = vld [vmem:[#allocation2 + $0x4c0] ss:$16 sps:$4 sm:$0xff]  }
  0x59   :  { %1728 = vmatprep.subr.bf16.mxu1 %v4361_v37  ;;  %v4412_v13 = vld [vmem:[#allocation2 + $0x6c4] ss:$16 sps:$4 sm:$0xff]   ;;  %v4410_v15 = vld [vmem:[#allocation2 + $0x6c0] ss:$16 sps:$4 sm:$0xff]   ;;  %v5225_v37 = vpack.c.bf16 %v100_v34, %v100_v34  ;;  %v4515_v34 = vld [vmem:[#allocation2 + $0x88] ss:$16 sps:$4 sm:$0xff]  }
  0x5a   :  { %v4415_v16 = vld [vmem:[#allocation2 + $0x4a4] ss:$16 sps:$4 sm:$0xff]   ;;  %v4413_v18 = vld [vmem:[#allocation2 + $0x4a0] ss:$16 sps:$4 sm:$0xff]  }
  0x5b   :  { %1688 = vmatpush2.bf16.msra.mxu0 %v4363_v38  ;;  %v4418_v17 = vld [vmem:[#allocation2 + $0x6a4] ss:$16 sps:$4 sm:$0xff]   ;;  %v4416_v19 = vld [vmem:[#allocation2 + $0x6a0] ss:$16 sps:$4 sm:$0xff]   ;;  %v102_v38 = vld [vmem:[%s5355_s0 + $0x38] sm:$0xff] }
  0x5c   :  { %1729 = vmatpush2.bf16.msra.mxu1 %v4364_v39  ;;  %1689 = vmatprep.subr.bf16.mxu0 %v4365_v40  ;;  %v4421_v20 = vld [vmem:[#allocation2 + $0x484] ss:$16 sps:$4 sm:$0xff]   ;;  %v4419_v22 = vld [vmem:[#allocation2 + $0x480] ss:$16 sps:$4 sm:$0xff]   ;;  %v5230_v40 = vpack.c.bf16 %v102_v38, %v102_v38  ;;  %v4526_v38 = vld [vmem:[#allocation2 + $0x26c] ss:$16 sps:$4 sm:$0xff]  }
  0x5d   :  { %1730 = vmatprep.subr.bf16.mxu1 %v4367_v41  ;;  %v4424_v21 = vld [vmem:[#allocation2 + $0x684] ss:$16 sps:$4 sm:$0xff]   ;;  %v4422_v23 = vld [vmem:[#allocation2 + $0x680] ss:$16 sps:$4 sm:$0xff]  }
  0x5e   :  { %v4427_v24 = vld [vmem:[#allocation2 + $0x464] ss:$16 sps:$4 sm:$0xff]   ;;  %v4425_v26 = vld [vmem:[#allocation2 + $0x460] ss:$16 sps:$4 sm:$0xff]  }
  0x5f   :  { %1690 = vmatpush2.bf16.msra.mxu0 %v4369_v42  ;;  %v4430_v25 = vld [vmem:[#allocation2 + $0x664] ss:$16 sps:$4 sm:$0xff]   ;;  %v4428_v27 = vld [vmem:[#allocation2 + $0x660] ss:$16 sps:$4 sm:$0xff]  }
  0x60   :  { %1731 = vmatpush2.bf16.msra.mxu1 %v4370_v43  ;;  %1691 = vmatprep.subr.bf16.mxu0 %v4371_v44  ;;  %v4433_v28 = vld [vmem:[#allocation2 + $0x444] ss:$16 sps:$4 sm:$0xff]   ;;  %v4431_v30 = vld [vmem:[#allocation2 + $0x440] ss:$16 sps:$4 sm:$0xff]  }
  0x61   :  { %1732 = vmatprep.subr.bf16.mxu1 %v4373_v45  ;;  %v4436_v29 = vld [vmem:[#allocation2 + $0x644] ss:$16 sps:$4 sm:$0xff]   ;;  %v4434_v31 = vld [vmem:[#allocation2 + $0x640] ss:$16 sps:$4 sm:$0xff]  }
  0x62   :  { %v4439_v32 = vld [vmem:[#allocation2 + $0x424] ss:$16 sps:$4 sm:$0xff]   ;;  %v4437_v35 = vld [vmem:[#allocation2 + $0x420] ss:$16 sps:$4 sm:$0xff]  }
  0x63   :  { %1692 = vmatpush2.bf16.msra.mxu0 %v4375_v47  ;;  %v4442_v33 = vld [vmem:[#allocation2 + $0x624] ss:$16 sps:$4 sm:$0xff]   ;;  %v4440_v36 = vld [vmem:[#allocation2 + $0x620] ss:$16 sps:$4 sm:$0xff]  }
  0x64   :  { %1733 = vmatpush2.bf16.msra.mxu1 %v4376_v48  ;;  %1693 = vmatprep.subr.bf16.mxu0 %v4377_v51  ;;  %v4445_v39 = vld [vmem:[#allocation2 + $0x404] ss:$16 sps:$4 sm:$0xff]   ;;  %v4443_v42 = vld [vmem:[#allocation2 + $0x400] ss:$16 sps:$4 sm:$0xff]  }
  0x65   :  { %1734 = vmatprep.subr.bf16.mxu1 %v4379_v53  ;;  %v4448_v41 = vld [vmem:[#allocation2 + $0x604] ss:$16 sps:$4 sm:$0xff]   ;;  %v4446_v43 = vld [vmem:[#allocation2 + $0x600] ss:$16 sps:$4 sm:$0xff]  }
  0x66   :  { %v4451_v44 = vld [vmem:[#allocation2 + $0x5e4] ss:$16 sps:$4 sm:$0xff]   ;;  %v4449_v46 = vld [vmem:[#allocation2 + $0x5e0] ss:$16 sps:$4 sm:$0xff]  }
  0x67   :  { %1694 = vmatpush2.bf16.msra.mxu0 %v4381_v54  ;;  %v4454_v45 = vld [vmem:[#allocation2 + $0x7e4] ss:$16 sps:$4 sm:$0xff]   ;;  %v4452_v47 = vld [vmem:[#allocation2 + $0x7e0] ss:$16 sps:$4 sm:$0xff]  }
  0x68   :  { %1735 = vmatpush2.bf16.msra.mxu1 %v4382_v55  ;;  %1695 = vmatprep.subr.bf16.mxu0 %v4383_v56  ;;  %v4457_v48 = vld [vmem:[#allocation2 + $0x5c4] ss:$16 sps:$4 sm:$0xff]   ;;  %v4455_v51 = vld [vmem:[#allocation2 + $0x5c0] ss:$16 sps:$4 sm:$0xff]  }
  0x69   :  { %1736 = vmatprep.subr.bf16.mxu1 %v4385_v57  ;;  %v4460_v50 = vld [vmem:[#allocation2 + $0x7c4] ss:$16 sps:$4 sm:$0xff]   ;;  %v4458_v53 = vld [vmem:[#allocation2 + $0x7c0] ss:$16 sps:$4 sm:$0xff]  }
  0x6a   :  { %v4463_v54 = vld [vmem:[#allocation2 + $0x5a4] ss:$16 sps:$4 sm:$0xff]   ;;  %v4461_v56 = vld [vmem:[#allocation2 + $0x5a0] ss:$16 sps:$4 sm:$0xff]  }
  0x6b   :  { %1696 = vmatpush2.bf16.msra.mxu0 %v4387_v58  ;;  %v4466_v55 = vld [vmem:[#allocation2 + $0x7a4] ss:$16 sps:$4 sm:$0xff]   ;;  %v4464_v57 = vld [vmem:[#allocation2 + $0x7a0] ss:$16 sps:$4 sm:$0xff]  }
  0x6c   :  { %1737 = vmatpush2.bf16.msra.mxu1 %v4388_v59  ;;  %1697 = vmatprep.subr.bf16.mxu0 %v4389_v60  ;;  %v4469_v58 = vld [vmem:[#allocation2 + $0x584] ss:$16 sps:$4 sm:$0xff]   ;;  %v4467_v60 = vld [vmem:[#allocation2 + $0x580] ss:$16 sps:$4 sm:$0xff]  }
  0x6d   :  { %1738 = vmatprep.subr.bf16.mxu1 %v4391_v61  ;;  %v4472_v59 = vld [vmem:[#allocation2 + $0x784] ss:$16 sps:$4 sm:$0xff]   ;;  %v4470_v61 = vld [vmem:[#allocation2 + $0x780] ss:$16 sps:$4 sm:$0xff]  }
  0x6e   :  { %v4479_v4 = vld [vmem:[#allocation2 + $0x540] ss:$16 sps:$4 sm:$0xff]  }
  0x6f   :  { %1698 = vmatpush2.bf16.msra.mxu0 %v4393_v62  ;;  %v4475_v62 = vld [vmem:[#allocation2 + $0x564] ss:$16 sps:$4 sm:$0xff]   ;;  %v4482_v5 = vld [vmem:[#allocation2 + $0x740] ss:$16 sps:$4 sm:$0xff]  }
  0x70   :  { %1739 = vmatpush2.bf16.msra.mxu1 %v4394_v63  ;;  %1699 = vmatprep.subr.bf16.mxu0 %v4395_v0  ;;  %v4478_v63 = vld [vmem:[#allocation2 + $0x764] ss:$16 sps:$4 sm:$0xff]   ;;  %v4473_v0 = vld [vmem:[#allocation2 + $0x560] ss:$16 sps:$4 sm:$0xff]  }
  0x71   :  { %1740 = vmatprep.subr.bf16.mxu1 %v4397_v1  ;;  %v4476_v1 = vld [vmem:[#allocation2 + $0x760] ss:$16 sps:$4 sm:$0xff]  }
  0x73   :  { %1700 = vmatpush2.bf16.msra.mxu0 %v4399_v2  ;;  %v4481_v2 = vld [vmem:[#allocation2 + $0x544] ss:$16 sps:$4 sm:$0xff]  }
  0x74   :  { %1741 = vmatpush2.bf16.msra.mxu1 %v4400_v3  ;;  %1751 = vmatprep.subr.bf16.mxu0 %v4403_v6  ;;  %v4484_v3 = vld [vmem:[#allocation2 + $0x744] ss:$16 sps:$4 sm:$0xff]  }
  0x75   :  { %1792 = vmatprep.subr.bf16.mxu1 %v4406_v7  ;;  %v4487_v6 = vld [vmem:[#allocation2 + $0x524] ss:$16 sps:$4 sm:$0xff]  }
  0x76   :  { %1702 = vmatmul.mubr.bf16.vlgmr.msra.gmra.mxu0 %v5216_v8  ;;  %v4490_v7 = vld [vmem:[#allocation2 + $0x724] ss:$16 sps:$4 sm:$0xff]  }
  0x77   :  { %1743 = vmatmul.mubr.bf16.vlgmr.msra.gmra.mxu1 %v5218_v9  ;;  %1752 = vmatpush1.bf16.msra.mxu0 %v4401_v10  ;;  %v4485_v10 = vld [vmem:[#allocation2 + $0x520] ss:$16 sps:$4 sm:$0xff]  }
  0x78   :  { %1793 = vmatpush1.bf16.msra.mxu1 %v4404_v11  ;;  %1753 = vmatprep.subr.bf16.mxu0 %v4409_v12  ;;  %v4488_v11 = vld [vmem:[#allocation2 + $0x720] ss:$16 sps:$4 sm:$0xff]   ;;  %v4493_v12 = vld [vmem:[#allocation2 + $0x504] ss:$16 sps:$4 sm:$0xff]  }
  0x79   :  { %1794 = vmatprep.subr.bf16.mxu1 %v4412_v13  ;;  %1783 = vmatprep.mubr.bf16.mxu0 %v5225_v37  ;;  %v4496_v13 = vld [vmem:[#allocation2 + $0x704] ss:$16 sps:$4 sm:$0xff]  }
  0x7a   :  { %1824 = vmatprep.mubr.bf16.mxu1 %v5230_v40 }
  0x7b   :  { %1754 = vmatpush1.bf16.msra.mxu0 %v4407_v14  ;;  %v4491_v14 = vld [vmem:[#allocation2 + $0x500] ss:$16 sps:$4 sm:$0xff]  }
  0x7c   :  { %1795 = vmatpush1.bf16.msra.mxu1 %v4410_v15  ;;  %1755 = vmatprep.subr.bf16.mxu0 %v4415_v16  ;;  %v4494_v15 = vld [vmem:[#allocation2 + $0x700] ss:$16 sps:$4 sm:$0xff]  }
  0x7d   :  { %1796 = vmatprep.subr.bf16.mxu1 %v4418_v17  ;;  %v99_v16 = vld [vmem:[%s5355_s0 + $0x20] sm:$0xff]  ;;  %v101_v17 = vld [vmem:[%s5355_s0 + $0x30] sm:$0xff] }
  0x7f   :  { %1756 = vmatpush1.bf16.msra.mxu0 %v4413_v18  ;;  %v4499_v18 = vld [vmem:[#allocation2 + $0xec] ss:$16 sps:$4 sm:$0xff]  }
  0x80   :  { %1797 = vmatpush1.bf16.msra.mxu1 %v4416_v19  ;;  %1757 = vmatprep.subr.bf16.mxu0 %v4421_v20  ;;  %v4502_v19 = vld [vmem:[#allocation2 + $0x2ec] ss:$16 sps:$4 sm:$0xff]   ;;  %v5240_v20 = vpack.c.bf16 %v99_v16, %v99_v16 }
  0x81   :  { %1798 = vmatprep.subr.bf16.mxu1 %v4424_v21  ;;  %v5242_v21 = vpack.c.bf16 %v101_v17, %v101_v17  ;;  %v4583_v16 = vld [vmem:[#allocation2 + $0x12c] ss:$16 sps:$4 sm:$0xff]  }
  0x82   :  { %v4586_v17 = vld [vmem:[#allocation2 + $0x32c] ss:$16 sps:$4 sm:$0xff]  }
  0x83   :  { %1758 = vmatpush1.bf16.msra.mxu0 %v4419_v22  ;;  %v4497_v22 = vld [vmem:[#allocation2 + $0xe8] ss:$16 sps:$4 sm:$0xff]  }
  0x84   :  { %1799 = vmatpush1.bf16.msra.mxu1 %v4422_v23  ;;  %1759 = vmatprep.subr.bf16.mxu0 %v4427_v24  ;;  %v4500_v23 = vld [vmem:[#allocation2 + $0x2e8] ss:$16 sps:$4 sm:$0xff]   ;;  %v4505_v24 = vld [vmem:[#allocation2 + $0xcc] ss:$16 sps:$4 sm:$0xff]  }
  0x85   :  { %1800 = vmatprep.subr.bf16.mxu1 %v4430_v25  ;;  %v4508_v25 = vld [vmem:[#allocation2 + $0x2cc] ss:$16 sps:$4 sm:$0xff]  }
  0x87   :  { %1760 = vmatpush1.bf16.msra.mxu0 %v4425_v26  ;;  %v4503_v26 = vld [vmem:[#allocation2 + $0xc8] ss:$16 sps:$4 sm:$0xff]  }
  0x88   :  { %1801 = vmatpush1.bf16.msra.mxu1 %v4428_v27  ;;  %1761 = vmatprep.subr.bf16.mxu0 %v4433_v28  ;;  %v4506_v27 = vld [vmem:[#allocation2 + $0x2c8] ss:$16 sps:$4 sm:$0xff]   ;;  %v4511_v28 = vld [vmem:[#allocation2 + $0xac] ss:$16 sps:$4 sm:$0xff]  }
  0x89   :  { %1802 = vmatprep.subr.bf16.mxu1 %v4436_v29  ;;  %v4514_v29 = vld [vmem:[#allocation2 + $0x2ac] ss:$16 sps:$4 sm:$0xff]  }
  0x8b   :  { %1762 = vmatpush1.bf16.msra.mxu0 %v4431_v30  ;;  %v4509_v30 = vld [vmem:[#allocation2 + $0xa8] ss:$16 sps:$4 sm:$0xff]  }
  0x8c   :  { %1803 = vmatpush1.bf16.msra.mxu1 %v4434_v31  ;;  %1763 = vmatprep.subr.bf16.mxu0 %v4439_v32  ;;  %v4512_v31 = vld [vmem:[#allocation2 + $0x2a8] ss:$16 sps:$4 sm:$0xff]   ;;  %v4517_v32 = vld [vmem:[#allocation2 + $0x8c] ss:$16 sps:$4 sm:$0xff]  }
  0x8d   :  { %1804 = vmatprep.subr.bf16.mxu1 %v4442_v33  ;;  %v4520_v33 = vld [vmem:[#allocation2 + $0x28c] ss:$16 sps:$4 sm:$0xff]  }
  0x8f   :  { %1764 = vmatpush1.bf16.msra.mxu0 %v4437_v35  ;;  %v4518_v35 = vld [vmem:[#allocation2 + $0x288] ss:$16 sps:$4 sm:$0xff]  }
  0x90   :  { %1805 = vmatpush1.bf16.msra.mxu1 %v4440_v36  ;;  %1765 = vmatprep.subr.bf16.mxu0 %v4445_v39  ;;  %v4523_v36 = vld [vmem:[#allocation2 + $0x6c] ss:$16 sps:$4 sm:$0xff]   ;;  %v4521_v39 = vld [vmem:[#allocation2 + $0x68] ss:$16 sps:$4 sm:$0xff]  }
  0x91   :  { %1806 = vmatprep.subr.bf16.mxu1 %v4448_v41  ;;  %v4532_v41 = vld [vmem:[#allocation2 + $0x24c] ss:$16 sps:$4 sm:$0xff]  }
  0x93   :  { %1766 = vmatpush1.bf16.msra.mxu0 %v4443_v42  ;;  %v4527_v42 = vld [vmem:[#allocation2 + $0x48] ss:$16 sps:$4 sm:$0xff]  }
  0x94   :  { %1807 = vmatpush1.bf16.msra.mxu1 %v4446_v43  ;;  %1767 = vmatprep.subr.bf16.mxu0 %v4451_v44  ;;  %v4530_v43 = vld [vmem:[#allocation2 + $0x248] ss:$16 sps:$4 sm:$0xff]   ;;  %v4535_v44 = vld [vmem:[#allocation2 + $0x2c] ss:$16 sps:$4 sm:$0xff]  }
  0x95   :  { %1808 = vmatprep.subr.bf16.mxu1 %v4454_v45  ;;  %v4538_v45 = vld [vmem:[#allocation2 + $0x22c] ss:$16 sps:$4 sm:$0xff]  }
  0x97   :  { %1768 = vmatpush2.bf16.msra.mxu0 %v4449_v46  ;;  %v4533_v46 = vld [vmem:[#allocation2 + $0x28] ss:$16 sps:$4 sm:$0xff]  }
  0x98   :  { %1809 = vmatpush2.bf16.msra.mxu1 %v4452_v47  ;;  %1769 = vmatprep.subr.bf16.mxu0 %v4457_v48  ;;  %v4536_v47 = vld [vmem:[#allocation2 + $0x228] ss:$16 sps:$4 sm:$0xff]   ;;  %v4541_v48 = vld [vmem:[#allocation2 + $0xc] ss:$16 sps:$4 sm:$0xff]  }
  0x99   :  { %1810 = vmatprep.subr.bf16.mxu1 %v4460_v50  ;;  %v4544_v50 = vld [vmem:[#allocation2 + $0x20c] ss:$16 sps:$4 sm:$0xff]  }
  0x9b   :  { %1770 = vmatpush2.bf16.msra.mxu0 %v4455_v51  ;;  %v4539_v51 = vld [vmem:[#allocation2 + $0x8] ss:$16 sps:$4 sm:$0xff]  }
  0x9c   :  { %1811 = vmatpush2.bf16.msra.mxu1 %v4458_v53  ;;  %1771 = vmatprep.subr.bf16.mxu0 %v4463_v54  ;;  %v4542_v53 = vld [vmem:[#allocation2 + $0x208] ss:$16 sps:$4 sm:$0xff]   ;;  %v4547_v54 = vld [vmem:[#allocation2 + $0x1ec] ss:$16 sps:$4 sm:$0xff]  }
  0x9d   :  { %1812 = vmatprep.subr.bf16.mxu1 %v4466_v55  ;;  %v4550_v55 = vld [vmem:[#allocation2 + $0x3ec] ss:$16 sps:$4 sm:$0xff]  }
  0x9f   :  { %1772 = vmatpush2.bf16.msra.mxu0 %v4461_v56  ;;  %v4545_v56 = vld [vmem:[#allocation2 + $0x1e8] ss:$16 sps:$4 sm:$0xff]  }
  0xa0   :  { %1813 = vmatpush2.bf16.msra.mxu1 %v4464_v57  ;;  %1773 = vmatprep.subr.bf16.mxu0 %v4469_v58  ;;  %v4548_v57 = vld [vmem:[#allocation2 + $0x3e8] ss:$16 sps:$4 sm:$0xff]   ;;  %v4553_v58 = vld [vmem:[#allocation2 + $0x1cc] ss:$16 sps:$4 sm:$0xff]  }
  0xa1   :  { %1814 = vmatprep.subr.bf16.mxu1 %v4472_v59  ;;  %v4556_v59 = vld [vmem:[#allocation2 + $0x3cc] ss:$16 sps:$4 sm:$0xff]  }
  0xa3   :  { %1774 = vmatpush2.bf16.msra.mxu0 %v4467_v60  ;;  %v4551_v60 = vld [vmem:[#allocation2 + $0x1c8] ss:$16 sps:$4 sm:$0xff]  }
  0xa4   :  { %1815 = vmatpush2.bf16.msra.mxu1 %v4470_v61  ;;  %1775 = vmatprep.subr.bf16.mxu0 %v4475_v62  ;;  %v4554_v61 = vld [vmem:[#allocation2 + $0x3c8] ss:$16 sps:$4 sm:$0xff]   ;;  %v4559_v62 = vld [vmem:[#allocation2 + $0x1ac] ss:$16 sps:$4 sm:$0xff]  }
  0xa5   :  { %1816 = vmatprep.subr.bf16.mxu1 %v4478_v63  ;;  %v4562_v63 = vld [vmem:[#allocation2 + $0x3ac] ss:$16 sps:$4 sm:$0xff]  }
  0xa7   :  { %1776 = vmatpush2.bf16.msra.mxu0 %v4473_v0  ;;  %v4557_v0 = vld [vmem:[#allocation2 + $0x1a8] ss:$16 sps:$4 sm:$0xff]  }
  0xa8   :  { %1817 = vmatpush2.bf16.msra.mxu1 %v4476_v1  ;;  %1777 = vmatprep.subr.bf16.mxu0 %v4481_v2  ;;  %v4560_v1 = vld [vmem:[#allocation2 + $0x3a8] ss:$16 sps:$4 sm:$0xff]   ;;  %v4565_v2 = vld [vmem:[#allocation2 + $0x18c] ss:$16 sps:$4 sm:$0xff]  }
  0xa9   :  { %1818 = vmatprep.subr.bf16.mxu1 %v4484_v3  ;;  %v4568_v3 = vld [vmem:[#allocation2 + $0x38c] ss:$16 sps:$4 sm:$0xff]  }
  0xab   :  { %1778 = vmatpush2.bf16.msra.mxu0 %v4479_v4  ;;  %v4563_v4 = vld [vmem:[#allocation2 + $0x188] ss:$16 sps:$4 sm:$0xff]  }
  0xac   :  { %1819 = vmatpush2.bf16.msra.mxu1 %v4482_v5  ;;  %1779 = vmatprep.subr.bf16.mxu0 %v4487_v6  ;;  %v4566_v5 = vld [vmem:[#allocation2 + $0x388] ss:$16 sps:$4 sm:$0xff]   ;;  %v4571_v6 = vld [vmem:[#allocation2 + $0x16c] ss:$16 sps:$4 sm:$0xff]  }
  0xad   :  { %1820 = vmatprep.subr.bf16.mxu1 %v4490_v7  ;;  %v4574_v7 = vld [vmem:[#allocation2 + $0x36c] ss:$16 sps:$4 sm:$0xff]  }
  0xaf   :  { %1780 = vmatpush2.bf16.msra.mxu0 %v4485_v10  ;;  %v4569_v10 = vld [vmem:[#allocation2 + $0x168] ss:$16 sps:$4 sm:$0xff]  }
  0xb0   :  { %1821 = vmatpush2.bf16.msra.mxu1 %v4488_v11  ;;  %1781 = vmatprep.subr.bf16.mxu0 %v4493_v12  ;;  %v4572_v11 = vld [vmem:[#allocation2 + $0x368] ss:$16 sps:$4 sm:$0xff]   ;;  %v4577_v12 = vld [vmem:[#allocation2 + $0x14c] ss:$16 sps:$4 sm:$0xff]  }
  0xb1   :  { %1822 = vmatprep.subr.bf16.mxu1 %v4496_v13  ;;  %v4580_v13 = vld [vmem:[#allocation2 + $0x34c] ss:$16 sps:$4 sm:$0xff]  }
  0xb3   :  { %1782 = vmatpush2.bf16.msra.mxu0 %v4491_v14  ;;  %v4575_v14 = vld [vmem:[#allocation2 + $0x148] ss:$16 sps:$4 sm:$0xff]  }
  0xb4   :  { %1823 = vmatpush2.bf16.msra.mxu1 %v4494_v15  ;;  %1833 = vmatprep.subr.bf16.mxu0 %v4499_v18  ;;  %v4578_v15 = vld [vmem:[#allocation2 + $0x348] ss:$16 sps:$4 sm:$0xff]  }
  0xb5   :  { %1874 = vmatprep.subr.bf16.mxu1 %v4502_v19  ;;  %v4581_v18 = vld [vmem:[#allocation2 + $0x128] ss:$16 sps:$4 sm:$0xff]  }
  0xb6   :  { %1784 = vmatmul.mubr.bf16.vlgmr.msra.gmra.mxu0 %v5240_v20  ;;  %v4584_v19 = vld [vmem:[#allocation2 + $0x328] ss:$16 sps:$4 sm:$0xff]  }
  0xb7   :  { %1825 = vmatmul.mubr.bf16.vlgmr.msra.gmra.mxu1 %v5242_v21  ;;  %1834 = vmatpush1.bf16.msra.mxu0 %v4497_v22  ;;  %v4589_v22 = vld [vmem:[#allocation2 + $0x10c] ss:$16 sps:$4 sm:$0xff]  }
  0xb8   :  { %1875 = vmatpush1.bf16.msra.mxu1 %v4500_v23  ;;  %1835 = vmatprep.subr.bf16.mxu0 %v4505_v24  ;;  %v4592_v23 = vld [vmem:[#allocation2 + $0x30c] ss:$16 sps:$4 sm:$0xff]   ;;  %v4587_v24 = vld [vmem:[#allocation2 + $0x108] ss:$16 sps:$4 sm:$0xff]  }
  0xb9   :  { %1876 = vmatprep.subr.bf16.mxu1 %v4508_v25  ;;  %1865 = vmatprep.mubr.bf16.mxu0 %v5201_v49  ;;  %v4524_v49 = vld [vmem:[#allocation2 + $0x268] ss:$16 sps:$4 sm:$0xff]  }
  0xba   :  { %1906 = vmatprep.mubr.bf16.mxu1 %v5206_v52  ;;  %v4529_v52 = vld [vmem:[#allocation2 + $0x4c] ss:$16 sps:$4 sm:$0xff]   ;;  %v4590_v25 = vld [vmem:[#allocation2 + $0x308] ss:$16 sps:$4 sm:$0xff]  }
  0xbb   :  { %1836 = vmatpush1.bf16.msra.mxu0 %v4503_v26  ;;  %v4595_v26 = vld [vmem:[#allocation2 + $0x4ec] ss:$16 sps:$4 sm:$0xff]  }
  0xbc   :  { %1877 = vmatpush1.bf16.msra.mxu1 %v4506_v27  ;;  %1837 = vmatprep.subr.bf16.mxu0 %v4511_v28  ;;  %v4598_v27 = vld [vmem:[#allocation2 + $0x6ec] ss:$16 sps:$4 sm:$0xff]   ;;  %v4593_v28 = vld [vmem:[#allocation2 + $0x4e8] ss:$16 sps:$4 sm:$0xff]  }
  0xbd   :  { %1878 = vmatprep.subr.bf16.mxu1 %v4514_v29  ;;  %v4596_v29 = vld [vmem:[#allocation2 + $0x6e8] ss:$16 sps:$4 sm:$0xff]  }
  0xbf   :  { %1838 = vmatpush1.bf16.msra.mxu0 %v4509_v30  ;;  %v4601_v30 = vld [vmem:[#allocation2 + $0x4cc] ss:$16 sps:$4 sm:$0xff]  }
  0xc0   :  { %1879 = vmatpush1.bf16.msra.mxu1 %v4512_v31  ;;  %1839 = vmatprep.subr.bf16.mxu0 %v4517_v32  ;;  %v4604_v31 = vld [vmem:[#allocation2 + $0x6cc] ss:$16 sps:$4 sm:$0xff]   ;;  %v4599_v32 = vld [vmem:[#allocation2 + $0x4c8] ss:$16 sps:$4 sm:$0xff]  }
  0xc1   :  { %1880 = vmatprep.subr.bf16.mxu1 %v4520_v33  ;;  %v4602_v33 = vld [vmem:[#allocation2 + $0x6c8] ss:$16 sps:$4 sm:$0xff]  }
  0xc3   :  { %1840 = vmatpush1.bf16.msra.mxu0 %v4515_v34  ;;  %v4607_v34 = vld [vmem:[#allocation2 + $0x4ac] ss:$16 sps:$4 sm:$0xff]  }
  0xc4   :  { %1881 = vmatpush1.bf16.msra.mxu1 %v4518_v35  ;;  %1841 = vmatprep.subr.bf16.mxu0 %v4523_v36  ;;  %v4610_v35 = vld [vmem:[#allocation2 + $0x6ac] ss:$16 sps:$4 sm:$0xff]   ;;  %v4605_v36 = vld [vmem:[#allocation2 + $0x4a8] ss:$16 sps:$4 sm:$0xff]  }
  0xc5   :  { %1882 = vmatprep.subr.bf16.mxu1 %v4526_v38  ;;  %v4608_v38 = vld [vmem:[#allocation2 + $0x6a8] ss:$16 sps:$4 sm:$0xff]  }
  0xc7   :  { %1842 = vmatpush1.bf16.msra.mxu0 %v4521_v39  ;;  %v4613_v39 = vld [vmem:[#allocation2 + $0x48c] ss:$16 sps:$4 sm:$0xff]  }
  0xc8   :  { %1883 = vmatpush1.bf16.msra.mxu1 %v4524_v49  ;;  %1843 = vmatprep.subr.bf16.mxu0 %v4529_v52  ;;  %v4611_v49 = vld [vmem:[#allocation2 + $0x488] ss:$16 sps:$4 sm:$0xff]   ;;  %v4619_v52 = vld [vmem:[#allocation2 + $0x46c] ss:$16 sps:$4 sm:$0xff]  }
  0xc9   :  { %1884 = vmatprep.subr.bf16.mxu1 %v4532_v41  ;;  %v4622_v41 = vld [vmem:[#allocation2 + $0x66c] ss:$16 sps:$4 sm:$0xff]  }
  0xcb   :  { %1844 = vmatpush1.bf16.msra.mxu0 %v4527_v42  ;;  %v4617_v42 = vld [vmem:[#allocation2 + $0x468] ss:$16 sps:$4 sm:$0xff]  }
  0xcc   :  { %1885 = vmatpush1.bf16.msra.mxu1 %v4530_v43  ;;  %1845 = vmatprep.subr.bf16.mxu0 %v4535_v44  ;;  %v4620_v43 = vld [vmem:[#allocation2 + $0x668] ss:$16 sps:$4 sm:$0xff]  }
  0xcd   :  { %1886 = vmatprep.subr.bf16.mxu1 %v4538_v45  ;;  %v4623_v44 = vld [vmem:[#allocation2 + $0x448] ss:$16 sps:$4 sm:$0xff]  }
  0xce   :  { %v4626_v45 = vld [vmem:[#allocation2 + $0x648] ss:$16 sps:$4 sm:$0xff]  }
  0xcf   :  { %1846 = vmatpush1.bf16.msra.mxu0 %v4533_v46  ;;  %v4631_v46 = vld [vmem:[#allocation2 + $0x42c] ss:$16 sps:$4 sm:$0xff]  }
  0xd0   :  { %1887 = vmatpush1.bf16.msra.mxu1 %v4536_v47  ;;  %1847 = vmatprep.subr.bf16.mxu0 %v4541_v48  ;;  %v4634_v47 = vld [vmem:[#allocation2 + $0x62c] ss:$16 sps:$4 sm:$0xff]   ;;  %v4629_v48 = vld [vmem:[#allocation2 + $0x428] ss:$16 sps:$4 sm:$0xff]  }
  0xd1   :  { %1888 = vmatprep.subr.bf16.mxu1 %v4544_v50  ;;  %v4632_v50 = vld [vmem:[#allocation2 + $0x628] ss:$16 sps:$4 sm:$0xff]  }
  0xd3   :  { %1848 = vmatpush1.bf16.msra.mxu0 %v4539_v51  ;;  %v4637_v51 = vld [vmem:[#allocation2 + $0x40c] ss:$16 sps:$4 sm:$0xff]  }
  0xd4   :  { %1889 = vmatpush1.bf16.msra.mxu1 %v4542_v53  ;;  %1849 = vmatprep.subr.bf16.mxu0 %v4547_v54  ;;  %v4640_v53 = vld [vmem:[#allocation2 + $0x60c] ss:$16 sps:$4 sm:$0xff]   ;;  %v4635_v54 = vld [vmem:[#allocation2 + $0x408] ss:$16 sps:$4 sm:$0xff]  }
  0xd5   :  { %1890 = vmatprep.subr.bf16.mxu1 %v4550_v55  ;;  %v4638_v55 = vld [vmem:[#allocation2 + $0x608] ss:$16 sps:$4 sm:$0xff]  }
  0xd7   :  { %1850 = vmatpush2.bf16.msra.mxu0 %v4545_v56  ;;  %v4643_v56 = vld [vmem:[#allocation2 + $0x5ec] ss:$16 sps:$4 sm:$0xff]  }
  0xd8   :  { %1891 = vmatpush2.bf16.msra.mxu1 %v4548_v57  ;;  %1851 = vmatprep.subr.bf16.mxu0 %v4553_v58  ;;  %v4646_v57 = vld [vmem:[#allocation2 + $0x7ec] ss:$16 sps:$4 sm:$0xff]   ;;  %v4641_v58 = vld [vmem:[#allocation2 + $0x5e8] ss:$16 sps:$4 sm:$0xff]  }
  0xd9   :  { %1892 = vmatprep.subr.bf16.mxu1 %v4556_v59  ;;  %v4644_v59 = vld [vmem:[#allocation2 + $0x7e8] ss:$16 sps:$4 sm:$0xff]  }
  0xdb   :  { %1852 = vmatpush2.bf16.msra.mxu0 %v4551_v60  ;;  %v4649_v60 = vld [vmem:[#allocation2 + $0x5cc] ss:$16 sps:$4 sm:$0xff]  }
  0xdc   :  { %1893 = vmatpush2.bf16.msra.mxu1 %v4554_v61  ;;  %1853 = vmatprep.subr.bf16.mxu0 %v4559_v62  ;;  %v4652_v61 = vld [vmem:[#allocation2 + $0x7cc] ss:$16 sps:$4 sm:$0xff]   ;;  %v4647_v62 = vld [vmem:[#allocation2 + $0x5c8] ss:$16 sps:$4 sm:$0xff]  }
  0xdd   :  { %1894 = vmatprep.subr.bf16.mxu1 %v4562_v63  ;;  %v4650_v63 = vld [vmem:[#allocation2 + $0x7c8] ss:$16 sps:$4 sm:$0xff]  }
  0xdf   :  { %1854 = vmatpush2.bf16.msra.mxu0 %v4557_v0  ;;  %v4655_v0 = vld [vmem:[#allocation2 + $0x5ac] ss:$16 sps:$4 sm:$0xff]  }
  0xe0   :  { %1895 = vmatpush2.bf16.msra.mxu1 %v4560_v1  ;;  %1855 = vmatprep.subr.bf16.mxu0 %v4565_v2  ;;  %v4658_v1 = vld [vmem:[#allocation2 + $0x7ac] ss:$16 sps:$4 sm:$0xff]   ;;  %v4653_v2 = vld [vmem:[#allocation2 + $0x5a8] ss:$16 sps:$4 sm:$0xff]  }
  0xe1   :  { %1896 = vmatprep.subr.bf16.mxu1 %v4568_v3  ;;  %v4656_v3 = vld [vmem:[#allocation2 + $0x7a8] ss:$16 sps:$4 sm:$0xff]  }
  0xe3   :  { %1856 = vmatpush2.bf16.msra.mxu0 %v4563_v4  ;;  %v4661_v4 = vld [vmem:[#allocation2 + $0x58c] ss:$16 sps:$4 sm:$0xff]  }
  0xe4   :  { %1897 = vmatpush2.bf16.msra.mxu1 %v4566_v5  ;;  %1857 = vmatprep.subr.bf16.mxu0 %v4571_v6  ;;  %v4664_v5 = vld [vmem:[#allocation2 + $0x78c] ss:$16 sps:$4 sm:$0xff]   ;;  %v4659_v6 = vld [vmem:[#allocation2 + $0x588] ss:$16 sps:$4 sm:$0xff]  }
  0xe5   :  { %1898 = vmatprep.subr.bf16.mxu1 %v4574_v7  ;;  %v4662_v7 = vld [vmem:[#allocation2 + $0x788] ss:$16 sps:$4 sm:$0xff]  }
  0xe7   :  { %1858 = vmatpush2.bf16.msra.mxu0 %v4569_v10  ;;  %v4667_v10 = vld [vmem:[#allocation2 + $0x56c] ss:$16 sps:$4 sm:$0xff]  }
  0xe8   :  { %1899 = vmatpush2.bf16.msra.mxu1 %v4572_v11  ;;  %1859 = vmatprep.subr.bf16.mxu0 %v4577_v12  ;;  %v4670_v11 = vld [vmem:[#allocation2 + $0x76c] ss:$16 sps:$4 sm:$0xff]   ;;  %v4665_v12 = vld [vmem:[#allocation2 + $0x568] ss:$16 sps:$4 sm:$0xff]  }
  0xe9   :  { %1900 = vmatprep.subr.bf16.mxu1 %v4580_v13  ;;  %v4668_v13 = vld [vmem:[#allocation2 + $0x768] ss:$16 sps:$4 sm:$0xff]  }
  0xeb   :  { %1860 = vmatpush2.bf16.msra.mxu0 %v4575_v14  ;;  %v4673_v14 = vld [vmem:[#allocation2 + $0x54c] ss:$16 sps:$4 sm:$0xff]  }
  0xec   :  { %1901 = vmatpush2.bf16.msra.mxu1 %v4578_v15  ;;  %1861 = vmatprep.subr.bf16.mxu0 %v4583_v16  ;;  %v4676_v15 = vld [vmem:[#allocation2 + $0x74c] ss:$16 sps:$4 sm:$0xff]   ;;  %v4671_v16 = vld [vmem:[#allocation2 + $0x548] ss:$16 sps:$4 sm:$0xff]  }
  0xed   :  { %1902 = vmatprep.subr.bf16.mxu1 %v4586_v17  ;;  %v4674_v17 = vld [vmem:[#allocation2 + $0x748] ss:$16 sps:$4 sm:$0xff]  }
  0xef   :  { %1862 = vmatpush2.bf16.msra.mxu0 %v4581_v18  ;;  %v4679_v18 = vld [vmem:[#allocation2 + $0x52c] ss:$16 sps:$4 sm:$0xff]  }
  0xf0   :  { %1903 = vmatpush2.bf16.msra.mxu1 %v4584_v19  ;;  %1863 = vmatprep.subr.bf16.mxu0 %v4589_v22  ;;  %v4682_v19 = vld [vmem:[#allocation2 + $0x72c] ss:$16 sps:$4 sm:$0xff]   ;;  %v4677_v22 = vld [vmem:[#allocation2 + $0x528] ss:$16 sps:$4 sm:$0xff]  }
  0xf1   :  { %1904 = vmatprep.subr.bf16.mxu1 %v4592_v23  ;;  %v4680_v23 = vld [vmem:[#allocation2 + $0x728] ss:$16 sps:$4 sm:$0xff]  }
  0xf3   :  { %1864 = vmatpush2.bf16.msra.mxu0 %v4587_v24  ;;  %v4685_v24 = vld [vmem:[#allocation2 + $0x50c] ss:$16 sps:$4 sm:$0xff]  }
  0xf4   :  { %1905 = vmatpush2.bf16.msra.mxu1 %v4590_v25  ;;  %1915 = vmatprep.subr.bf16.mxu0 %v4595_v26  ;;  %v4688_v25 = vld [vmem:[#allocation2 + $0x70c] ss:$16 sps:$4 sm:$0xff]   ;;  %v4683_v26 = vld [vmem:[#allocation2 + $0x508] ss:$16 sps:$4 sm:$0xff]  }
  0xf5   :  { %1956 = vmatprep.subr.bf16.mxu1 %v4598_v27  ;;  %v4686_v27 = vld [vmem:[#allocation2 + $0x708] ss:$16 sps:$4 sm:$0xff]  }
  0xf6   :  { %1866 = vmatmul.mubr.bf16.vlgmr.msra.gmra.mxu0 %v5216_v8  ;;  %v4616_v8 = vld [vmem:[#allocation2 + $0x68c] ss:$16 sps:$4 sm:$0xff]  }
  0xf7   :  { %1907 = vmatmul.mubr.bf16.vlgmr.msra.gmra.mxu1 %v5218_v9  ;;  %1916 = vmatpush1.bf16.msra.mxu0 %v4593_v28  ;;  %v4614_v9 = vld [vmem:[#allocation2 + $0x688] ss:$16 sps:$4 sm:$0xff]   ;;  %v4691_v28 = vld [vmem:[#allocation5 + $0xe4] ss:$16 sps:$4 sm:$0xff]  }
  0xf8   :  { %1957 = vmatpush1.bf16.msra.mxu1 %v4596_v29  ;;  %1917 = vmatprep.subr.bf16.mxu0 %v4601_v30  ;;  %v4689_v29 = vld [vmem:[#allocation5 + $0xe0] ss:$16 sps:$4 sm:$0xff]   ;;  %v4694_v30 = vld [vmem:[#allocation5 + $0xc4] ss:$16 sps:$4 sm:$0xff]  }
  0xf9   :  { %1958 = vmatprep.subr.bf16.mxu1 %v4604_v31  ;;  %1947 = vmatprep.mubr.bf16.mxu0 %v5225_v37  ;;  %v4625_v37 = vld [vmem:[#allocation2 + $0x44c] ss:$16 sps:$4 sm:$0xff]  }
  0xfa   :  { %1988 = vmatprep.mubr.bf16.mxu1 %v5230_v40  ;;  %v4628_v40 = vld [vmem:[#allocation2 + $0x64c] ss:$16 sps:$4 sm:$0xff]  }
  0xfb   :  { %1918 = vmatpush1.bf16.msra.mxu0 %v4599_v32 }
  0xfc   :  { %1959 = vmatpush1.bf16.msra.mxu1 %v4602_v33  ;;  %1919 = vmatprep.subr.bf16.mxu0 %v4607_v34  ;;  %v4692_v33 = vld [vmem:[#allocation5 + $0xc0] ss:$16 sps:$4 sm:$0xff]  }
  0xfd   :  { %1960 = vmatprep.subr.bf16.mxu1 %v4610_v35 }
  0xff   :  { %1920 = vmatpush1.bf16.msra.mxu0 %v4605_v36  ;;  %v4697_v36 = vld [vmem:[#allocation5 + $0xa4] ss:$16 sps:$4 sm:$0xff]  }
 0x100   :  { %1961 = vmatpush1.bf16.msra.mxu1 %v4608_v38  ;;  %1921 = vmatprep.subr.bf16.mxu0 %v4613_v39  ;;  %v4695_v38 = vld [vmem:[#allocation5 + $0xa0] ss:$16 sps:$4 sm:$0xff]  }
 0x101   :  { %1962 = vmatprep.subr.bf16.mxu1 %v4616_v8 }
 0x103   :  { %1922 = vmatpush1.bf16.msra.mxu0 %v4611_v49 }
 0x104   :  { %1963 = vmatpush1.bf16.msra.mxu1 %v4614_v9  ;;  %1923 = vmatprep.subr.bf16.mxu0 %v4619_v52  ;;  %v4700_v52 = vld [vmem:[#allocation5 + $0x84] ss:$16 sps:$4 sm:$0xff]  }
 0x105   :  { %1964 = vmatprep.subr.bf16.mxu1 %v4622_v41  ;;  %v4698_v41 = vld [vmem:[#allocation5 + $0x80] ss:$16 sps:$4 sm:$0xff]  }
 0x107   :  { %1924 = vmatpush1.bf16.msra.mxu0 %v4617_v42  ;;  %v4787_v42 = vld [vmem:[#allocation5 + $0x2e4] ss:$16 sps:$4 sm:$0xff]  }
 0x108   :  { %1965 = vmatpush1.bf16.msra.mxu1 %v4620_v43  ;;  %1925 = vmatprep.subr.bf16.mxu0 %v4625_v37  ;;  %v4788_v43 = vld [vmem:[#allocation5 + $0x2c0] ss:$16 sps:$4 sm:$0xff]   ;;  %v4790_v37 = vld [vmem:[#allocation5 + $0x2c4] ss:$16 sps:$4 sm:$0xff]  }
 0x109   :  { %1966 = vmatprep.subr.bf16.mxu1 %v4628_v40  ;;  %v4701_v40 = vld [vmem:[#allocation5 + $0x60] ss:$16 sps:$4 sm:$0xff]  }
 0x10b   :  { %1926 = vmatpush1.bf16.msra.mxu0 %v4623_v44  ;;  %v4793_v44 = vld [vmem:[#allocation5 + $0x2a4] ss:$16 sps:$4 sm:$0xff]  }
 0x10c   :  { %1967 = vmatpush1.bf16.msra.mxu1 %v4626_v45  ;;  %1927 = vmatprep.subr.bf16.mxu0 %v4631_v46  ;;  %v4706_v45 = vld [vmem:[#allocation5 + $0x44] ss:$16 sps:$4 sm:$0xff]   ;;  %v4791_v46 = vld [vmem:[#allocation5 + $0x2a0] ss:$16 sps:$4 sm:$0xff]  }
 0x10d   :  { %1968 = vmatprep.subr.bf16.mxu1 %v4634_v47  ;;  %v4704_v47 = vld [vmem:[#allocation5 + $0x40] ss:$16 sps:$4 sm:$0xff]  }
 0x10f   :  { %1928 = vmatpush1.bf16.msra.mxu0 %v4629_v48  ;;  %v4796_v48 = vld [vmem:[#allocation5 + $0x284] ss:$16 sps:$4 sm:$0xff]  }
 0x110   :  { %1969 = vmatpush1.bf16.msra.mxu1 %v4632_v50  ;;  %1929 = vmatprep.subr.bf16.mxu0 %v4637_v51  ;;  %v4709_v50 = vld [vmem:[#allocation5 + $0x24] ss:$16 sps:$4 sm:$0xff]   ;;  %v4707_v51 = vld [vmem:[#allocation5 + $0x20] ss:$16 sps:$4 sm:$0xff]  }
 0x111   :  { %1970 = vmatprep.subr.bf16.mxu1 %v4640_v53  ;;  %v4712_v53 = vld [vmem:[#allocation5 + $0x4] ss:$16 sps:$4 sm:$0xff]  }
 0x113   :  { %1930 = vmatpush1.bf16.msra.mxu0 %v4635_v54  ;;  %v4794_v54 = vld [vmem:[#allocation5 + $0x280] ss:$16 sps:$4 sm:$0xff]  }
 0x114   :  { %1971 = vmatpush1.bf16.msra.mxu1 %v4638_v55  ;;  %1931 = vmatprep.subr.bf16.mxu0 %v4643_v56  ;;  %v4799_v55 = vld [vmem:[#allocation5 + $0x264] ss:$16 sps:$4 sm:$0xff]   ;;  %v4797_v56 = vld [vmem:[#allocation5 + $0x260] ss:$16 sps:$4 sm:$0xff]  }
 0x115   :  { %1972 = vmatprep.subr.bf16.mxu1 %v4646_v57  ;;  %v4710_v57 = vld [vmem:[#allocation5] ss:$16 sps:$4 sm:$0xff]  }
 0x117   :  { %1932 = vmatpush2.bf16.msra.mxu0 %v4641_v58  ;;  %v4802_v58 = vld [vmem:[#allocation5 + $0x244] ss:$16 sps:$4 sm:$0xff]  }
 0x118   :  { %1973 = vmatpush2.bf16.msra.mxu1 %v4644_v59  ;;  %1933 = vmatprep.subr.bf16.mxu0 %v4649_v60  ;;  %v4715_v59 = vld [vmem:[#allocation5 + $0x1e4] ss:$16 sps:$4 sm:$0xff]   ;;  %v4800_v60 = vld [vmem:[#allocation5 + $0x240] ss:$16 sps:$4 sm:$0xff]  }
 0x119   :  { %1974 = vmatprep.subr.bf16.mxu1 %v4652_v61  ;;  %v4713_v61 = vld [vmem:[#allocation5 + $0x1e0] ss:$16 sps:$4 sm:$0xff]  }
 0x11b   :  { %1934 = vmatpush2.bf16.msra.mxu0 %v4647_v62  ;;  %v4805_v62 = vld [vmem:[#allocation5 + $0x224] ss:$16 sps:$4 sm:$0xff]  }
 0x11c   :  { %1975 = vmatpush2.bf16.msra.mxu1 %v4650_v63  ;;  %1935 = vmatprep.subr.bf16.mxu0 %v4655_v0  ;;  %v4718_v63 = vld [vmem:[#allocation5 + $0x1c4] ss:$16 sps:$4 sm:$0xff]   ;;  %v4803_v0 = vld [vmem:[#allocation5 + $0x220] ss:$16 sps:$4 sm:$0xff]  }
 0x11d   :  { %1976 = vmatprep.subr.bf16.mxu1 %v4658_v1  ;;  %v4716_v1 = vld [vmem:[#allocation5 + $0x1c0] ss:$16 sps:$4 sm:$0xff]  }
 0x11f   :  { %1936 = vmatpush2.bf16.msra.mxu0 %v4653_v2  ;;  %v4808_v2 = vld [vmem:[#allocation5 + $0x204] ss:$16 sps:$4 sm:$0xff]  }
 0x120   :  { %1977 = vmatpush2.bf16.msra.mxu1 %v4656_v3  ;;  %1937 = vmatprep.subr.bf16.mxu0 %v4661_v4  ;;  %v4721_v3 = vld [vmem:[#allocation5 + $0x1a4] ss:$16 sps:$4 sm:$0xff]   ;;  %v4806_v4 = vld [vmem:[#allocation5 + $0x200] ss:$16 sps:$4 sm:$0xff]  }
 0x121   :  { %1978 = vmatprep.subr.bf16.mxu1 %v4664_v5  ;;  %v4719_v5 = vld [vmem:[#allocation5 + $0x1a0] ss:$16 sps:$4 sm:$0xff]  }
 0x123   :  { %1938 = vmatpush2.bf16.msra.mxu0 %v4659_v6  ;;  %v4811_v6 = vld [vmem:[#allocation5 + $0x3e4] ss:$16 sps:$4 sm:$0xff]  }
 0x124   :  { %1979 = vmatpush2.bf16.msra.mxu1 %v4662_v7  ;;  %1939 = vmatprep.subr.bf16.mxu0 %v4667_v10  ;;  %v4724_v7 = vld [vmem:[#allocation5 + $0x184] ss:$16 sps:$4 sm:$0xff]   ;;  %v4809_v10 = vld [vmem:[#allocation5 + $0x3e0] ss:$16 sps:$4 sm:$0xff]  }
 0x125   :  { %1980 = vmatprep.subr.bf16.mxu1 %v4670_v11  ;;  %v4722_v11 = vld [vmem:[#allocation5 + $0x180] ss:$16 sps:$4 sm:$0xff]  }
 0x127   :  { %1940 = vmatpush2.bf16.msra.mxu0 %v4665_v12  ;;  %v4814_v12 = vld [vmem:[#allocation5 + $0x3c4] ss:$16 sps:$4 sm:$0xff]  }
 0x128   :  { %1981 = vmatpush2.bf16.msra.mxu1 %v4668_v13  ;;  %1941 = vmatprep.subr.bf16.mxu0 %v4673_v14  ;;  %v4727_v13 = vld [vmem:[#allocation5 + $0x164] ss:$16 sps:$4 sm:$0xff]   ;;  %v369_v14 = vlaneseq }
 0x129   :  { %1982 = vmatprep.subr.bf16.mxu1 %v4676_v15  ;;  %v4812_v15 = vld [vmem:[#allocation5 + $0x3c0] ss:$16 sps:$4 sm:$0xff]  }
 0x12b   :  { %1942 = vmatpush2.bf16.msra.mxu0 %v4671_v16  ;;  %v4725_v16 = vld [vmem:[#allocation5 + $0x160] ss:$16 sps:$4 sm:$0xff]  }
 0x12c   :  { %1983 = vmatpush2.bf16.msra.mxu1 %v4674_v17  ;;  %1943 = vmatprep.subr.bf16.mxu0 %v4679_v18  ;;  %v4817_v17 = vld [vmem:[#allocation5 + $0x3a4] ss:$16 sps:$4 sm:$0xff]  }
 0x12d   :  { %1984 = vmatprep.subr.bf16.mxu1 %v4682_v19  ;;  %v4730_v18 = vld [vmem:[#allocation5 + $0x144] ss:$16 sps:$4 sm:$0xff]   ;;  %v5262_v19 = vshrl.u32 %v369_v14, 7  ;;  %v4763_v14 = vld [vmem:[#allocation5 + $0x1ec] ss:$16 sps:$4 sm:$0xff]  }
 0x12f   :  { %1944 = vmatpush2.bf16.msra.mxu0 %v4677_v22  ;;  %v4815_v22 = vld [vmem:[#allocation5 + $0x3a0] ss:$16 sps:$4 sm:$0xff]  }
 0x130   :  { %1985 = vmatpush2.bf16.msra.mxu1 %v4680_v23  ;;  %1945 = vmatprep.subr.bf16.mxu0 %v4685_v24  ;;  %v4728_v23 = vld [vmem:[#allocation5 + $0x140] ss:$16 sps:$4 sm:$0xff]   ;;  %v4820_v24 = vld [vmem:[#allocation5 + $0x384] ss:$16 sps:$4 sm:$0xff]  }
 0x131   :  { %1986 = vmatprep.subr.bf16.mxu1 %v4688_v25  ;;  %v4733_v25 = vld [vmem:[#allocation5 + $0x124] ss:$16 sps:$4 sm:$0xff]  }
 0x133   :  { %1946 = vmatpush2.bf16.msra.mxu0 %v4683_v26  ;;  %v5265_v26 = vsub.s32 0, %v5262_v19 }
 0x134   :  { %1987 = vmatpush2.bf16.msra.mxu1 %v4686_v27  ;;  %2795 = vmatprep.subr.bf16.mxu0 %v4691_v28  ;;  %v5270_v27 = vld [vmem:[%s5357_s2] sm:$0xf] }
 0x135   :  { %2836 = vmatprep.subr.bf16.mxu1 %v4787_v42  ;;  %v4818_v28 = vld [vmem:[#allocation5 + $0x380] ss:$16 sps:$4 sm:$0xff]  }
 0x136   :  { %v5252_v31 = vpop.f32.mrf.mxu0  ;;  %1948 = vmatmul.mubr.bf16.vlgmr.msra.gmra.mxu0 %v5240_v20  ;;  %v4703_v20 = vld [vmem:[#allocation5 + $0x64] ss:$16 sps:$4 sm:$0xff]  }
 0x137   :  { %v5254_v32 = vpop.f32.mrf.mxu1  ;;  %1989 = vmatmul.mubr.bf16.vlgmr.msra.gmra.mxu1 %v5242_v21  ;;  %2796 = vmatpush1.bf16.msra.mxu0 %v4689_v29  ;;  %v4785_v21 = vld [vmem:[#allocation5 + $0x2e0] ss:$16 sps:$4 sm:$0xff]   ;;  %v5273_v29 = vsub.s32 1, %v5262_v19 }
 0x138   :  { %v5258_v34 = vpop.f32.mrf.mxu0  ;;  %2797 = vmatprep.subr.bf16.mxu0 %v4694_v30  ;;  %2837 = vmatpush1.bf16.msra.mxu1 %v4785_v21  ;;  %v4731_v30 = vld [vmem:[#allocation5 + $0x120] ss:$16 sps:$4 sm:$0xff]  }
 0x139   :  { %v5260_v35 = vpop.f32.mrf.mxu1  ;;  %2838 = vmatprep.subr.bf16.mxu1 %v4790_v37 }
 0x13a   :  { %v1707_v39 = vpop.f32.mrf.mxu0 }
 0x13b   :  { %v1748_v8 = vpop.f32.mrf.mxu1  ;;  %2798 = vmatpush1.bf16.msra.mxu0 %v4692_v33  ;;  %v4823_v33 = vld [vmem:[#allocation5 + $0x364] ss:$16 sps:$4 sm:$0xff]   ;;  %v4821_v39 = vld [vmem:[#allocation5 + $0x360] ss:$16 sps:$4 sm:$0xff]  }
 0x13c   :  { %v1708_v49 = vpop.f32.mrf.mxu0  ;;  %2799 = vmatprep.subr.bf16.mxu0 %v4697_v36  ;;  %2839 = vmatpush1.bf16.msra.mxu1 %v4788_v43  ;;  %v4736_v36 = vld [vmem:[#allocation5 + $0x104] ss:$16 sps:$4 sm:$0xff]   ;;  %v376_v8 = vrot.slane %v5270_v27, %v5273_v29 }
 0x13d   :  { %v1749_v9 = vpop.f32.mrf.mxu1  ;;  %2840 = vmatprep.subr.bf16.mxu1 %v4793_v44  ;;  %v4734_v49 = vld [vmem:[#allocation5 + $0x100] ss:$16 sps:$4 sm:$0xff]  }
 0x13e   :  { %v4826_v9 = vld [vmem:[#allocation5 + $0x344] ss:$16 sps:$4 sm:$0xff]   ;;  %v1706_v21 = vadd.f32 %v5258_v34, %v376_v8  ;;  %v4779_v8 = vld [vmem:[#allocation5 + $0x128] ss:$16 sps:$4 sm:$0xff]  }
 0x13f   :  { %2800 = vmatpush1.bf16.msra.mxu0 %v4695_v38  ;;  %v372_v38 = vrot.slane %v5270_v27, %v5265_v26 }
 0x140   :  { %2801 = vmatprep.subr.bf16.mxu0 %v4700_v52  ;;  %2841 = vmatpush1.bf16.msra.mxu1 %v4791_v46  ;;  %v4739_v52 = vld [vmem:[#allocation5 + $0xec] ss:$16 sps:$4 sm:$0xff]  }
 0x141   :  { %2842 = vmatprep.subr.bf16.mxu1 %v4796_v48 }
 0x143   :  { %2802 = vmatpush1.bf16.msra.mxu0 %v4698_v41  ;;  %v1704_v41 = vadd.f32 %v5252_v31, %v372_v38 }
 0x144   :  { %2803 = vmatprep.subr.bf16.mxu0 %v4703_v20  ;;  %2843 = vmatpush1.bf16.msra.mxu1 %v4794_v54  ;;  %v4824_v20 = vld [vmem:[#allocation5 + $0x340] ss:$16 sps:$4 sm:$0xff]  }
 0x145   :  { %2844 = vmatprep.subr.bf16.mxu1 %v4799_v55  ;;  %v1745_v42 = vadd.f32 %v5254_v32, %v1704_v41 }
 0x147   :  { %2804 = vmatpush1.bf16.msra.mxu0 %v4701_v40  ;;  %v1747_v40 = vadd.f32 %v5260_v35, %v1706_v21  ;;  %v4782_v21 = vld [vmem:[#allocation5 + $0x108] ss:$16 sps:$4 sm:$0xff]  }
 0x148   :  { %2805 = vmatprep.subr.bf16.mxu0 %v4706_v45  ;;  %2845 = vmatpush1.bf16.msra.mxu1 %v4797_v56  ;;  %v4832_v56 = vld [vmem:[#allocation5 + $0x304] ss:$16 sps:$4 sm:$0xff]  }
 0x149   :  { %2846 = vmatprep.subr.bf16.mxu1 %v4802_v58  ;;  %v4830_v58 = vld [vmem:[#allocation5 + $0x300] ss:$16 sps:$4 sm:$0xff]  }
 0x14b   :  { %2806 = vmatpush1.bf16.msra.mxu0 %v4704_v47  ;;  %v4829_v47 = vld [vmem:[#allocation5 + $0x324] ss:$16 sps:$4 sm:$0xff]  }
 0x14c   :  { %2807 = vmatprep.subr.bf16.mxu0 %v4709_v50  ;;  %2847 = vmatpush1.bf16.msra.mxu1 %v4800_v60  ;;  %v4827_v50 = vld [vmem:[#allocation5 + $0x320] ss:$16 sps:$4 sm:$0xff]  }
 0x14d   :  { %2848 = vmatprep.subr.bf16.mxu1 %v4805_v62  ;;  %v4835_v62 = vld [vmem:[#allocation5 + $0x2ec] ss:$16 sps:$4 sm:$0xff]  }
 0x14f   :  { %2808 = vmatpush1.bf16.msra.mxu0 %v4707_v51 }
 0x150   :  { %2809 = vmatprep.subr.bf16.mxu0 %v4712_v53  ;;  %2849 = vmatpush1.bf16.msra.mxu1 %v4803_v0  ;;  %v4745_v0 = vld [vmem:[#allocation5 + $0xac] ss:$16 sps:$4 sm:$0xff]  }
 0x151   :  { %2850 = vmatprep.subr.bf16.mxu1 %v4808_v2  ;;  %v4748_v2 = vld [vmem:[#allocation5 + $0x8c] ss:$16 sps:$4 sm:$0xff]  }
 0x153   :  { %2810 = vmatpush1.bf16.msra.mxu0 %v4710_v57 }
 0x154   :  { %2811 = vmatprep.subr.bf16.mxu0 %v4715_v59  ;;  %2851 = vmatpush1.bf16.msra.mxu1 %v4806_v4  ;;  %v4737_v59 = vld [vmem:[#allocation5 + $0xe8] ss:$16 sps:$4 sm:$0xff]   ;;  %v4751_v4 = vld [vmem:[#allocation5 + $0x6c] ss:$16 sps:$4 sm:$0xff]  }
 0x155   :  { %2852 = vmatprep.subr.bf16.mxu1 %v4811_v6  ;;  %v4754_v6 = vld [vmem:[#allocation5 + $0x4c] ss:$16 sps:$4 sm:$0xff]  }
 0x157   :  { %2812 = vmatpush2.bf16.msra.mxu0 %v4713_v61  ;;  %v4742_v61 = vld [vmem:[#allocation5 + $0xcc] ss:$16 sps:$4 sm:$0xff]  }
 0x158   :  { %2813 = vmatprep.subr.bf16.mxu0 %v4718_v63  ;;  %2853 = vmatpush2.bf16.msra.mxu1 %v4809_v10  ;;  %v4740_v63 = vld [vmem:[#allocation5 + $0xc8] ss:$16 sps:$4 sm:$0xff]   ;;  %v4757_v10 = vld [vmem:[#allocation5 + $0x2c] ss:$16 sps:$4 sm:$0xff]  }
 0x159   :  { %2854 = vmatprep.subr.bf16.mxu1 %v4814_v12  ;;  %v4760_v12 = vld [vmem:[#allocation5 + $0xc] ss:$16 sps:$4 sm:$0xff]  }
 0x15b   :  { %2814 = vmatpush2.bf16.msra.mxu0 %v4716_v1  ;;  %v4743_v1 = vld [vmem:[#allocation5 + $0xa8] ss:$16 sps:$4 sm:$0xff]  }
 0x15c   :  { %2815 = vmatprep.subr.bf16.mxu0 %v4721_v3  ;;  %2855 = vmatpush2.bf16.msra.mxu1 %v4812_v15  ;;  %v4746_v3 = vld [vmem:[#allocation5 + $0x88] ss:$16 sps:$4 sm:$0xff]  }
 0x15d   :  { %2856 = vmatprep.subr.bf16.mxu1 %v4817_v17  ;;  %v4761_v15 = vld [vmem:[#allocation5 + $0x1e8] ss:$16 sps:$4 sm:$0xff]  }
 0x15e   :  { %v4764_v17 = vld [vmem:[#allocation5 + $0x1c8] ss:$16 sps:$4 sm:$0xff]  }
 0x15f   :  { %2816 = vmatpush2.bf16.msra.mxu0 %v4719_v5  ;;  %v4749_v5 = vld [vmem:[#allocation5 + $0x68] ss:$16 sps:$4 sm:$0xff]  }
 0x160   :  { %2817 = vmatprep.subr.bf16.mxu0 %v4724_v7  ;;  %2857 = vmatpush2.bf16.msra.mxu1 %v4815_v22  ;;  %v4752_v7 = vld [vmem:[#allocation5 + $0x48] ss:$16 sps:$4 sm:$0xff]  }
 0x161   :  { %2858 = vmatprep.subr.bf16.mxu1 %v4820_v24  ;;  %v4767_v22 = vld [vmem:[#allocation5 + $0x1a8] ss:$16 sps:$4 sm:$0xff]  }
 0x162   :  { %v4770_v24 = vld [vmem:[#allocation5 + $0x188] ss:$16 sps:$4 sm:$0xff]  }
 0x163   :  { %2818 = vmatpush2.bf16.msra.mxu0 %v4722_v11  ;;  %v4755_v11 = vld [vmem:[#allocation5 + $0x28] ss:$16 sps:$4 sm:$0xff]  }
 0x164   :  { %2819 = vmatprep.subr.bf16.mxu0 %v4727_v13  ;;  %2859 = vmatpush2.bf16.msra.mxu1 %v4818_v28  ;;  %v4758_v13 = vld [vmem:[#allocation5 + $0x8] ss:$16 sps:$4 sm:$0xff]  }
 0x165   :  { %2860 = vmatprep.subr.bf16.mxu1 %v4823_v33  ;;  %v4773_v28 = vld [vmem:[#allocation5 + $0x168] ss:$16 sps:$4 sm:$0xff]  }
 0x166   :  { %v4776_v33 = vld [vmem:[#allocation5 + $0x148] ss:$16 sps:$4 sm:$0xff]  }
 0x167   :  { %2820 = vmatpush2.bf16.msra.mxu0 %v4725_v16  ;;  %v4766_v16 = vld [vmem:[#allocation5 + $0x1cc] ss:$16 sps:$4 sm:$0xff]  }
 0x168   :  { %2821 = vmatprep.subr.bf16.mxu0 %v4730_v18  ;;  %2861 = vmatpush2.bf16.msra.mxu1 %v4821_v39  ;;  %v4769_v18 = vld [vmem:[#allocation5 + $0x1ac] ss:$16 sps:$4 sm:$0xff]  }
 0x169   :  { %2862 = vmatprep.subr.bf16.mxu1 %v4826_v9 }
 0x16b   :  { %2822 = vmatpush2.bf16.msra.mxu0 %v4728_v23  ;;  %v4772_v23 = vld [vmem:[#allocation5 + $0x18c] ss:$16 sps:$4 sm:$0xff]  }
 0x16c   :  { %2823 = vmatprep.subr.bf16.mxu0 %v4733_v25  ;;  %2863 = vmatpush2.bf16.msra.mxu1 %v4824_v20  ;;  %v4775_v25 = vld [vmem:[#allocation5 + $0x16c] ss:$16 sps:$4 sm:$0xff]  }
 0x16d   :  { %2864 = vmatprep.subr.bf16.mxu1 %v4829_v47 }
 0x16f   :  { %2824 = vmatpush2.bf16.msra.mxu0 %v4731_v30  ;;  %v4778_v30 = vld [vmem:[#allocation5 + $0x14c] ss:$16 sps:$4 sm:$0xff]  }
 0x170   :  { %2825 = vmatprep.subr.bf16.mxu0 %v4736_v36  ;;  %2865 = vmatpush2.bf16.msra.mxu1 %v4827_v50  ;;  %v4781_v36 = vld [vmem:[#allocation5 + $0x12c] ss:$16 sps:$4 sm:$0xff]  }
 0x171   :  { %2866 = vmatprep.subr.bf16.mxu1 %v4832_v56 }
 0x173   :  { %2826 = vmatpush2.bf16.msra.mxu0 %v4734_v49 }
 0x174   :  { %2877 = vmatprep.subr.bf16.mxu0 %v4739_v52  ;;  %2867 = vmatpush2.bf16.msra.mxu1 %v4830_v58  ;;  %v4784_v52 = vld [vmem:[#allocation5 + $0x10c] ss:$16 sps:$4 sm:$0xff]  }
 0x175   :  { %2918 = vmatprep.subr.bf16.mxu1 %v4835_v62 }
 0x176   :  { %v1785_v43 = vpop.f32.mrf.mxu0 }
 0x177   :  { %v1826_v37 = vpop.f32.mrf.mxu1  ;;  %v1786_v44 = vadd.f32 %v1785_v43, %v1745_v42 }
 0x178   :  { %v1787_v45 = vpop.f32.mrf.mxu0 }
 0x179   :  { %v1828_v46 = vpop.f32.mrf.mxu1  ;;  %v1827_v48 = vadd.f32 %v1826_v37, %v1786_v44  ;;  %v1788_v31 = vadd.f32 %v1787_v45, %v1747_v40  ;;  %v379_v37 = vsub.s32 2, %v5262_v19  ;;  %v383_v40 = vsub.s32 3, %v5262_v19  ;;  %v4980_v19 = vld [vmem:[#allocation8 + $0x30] sm:$0xff]  }
 0x17a   :  { %v1789_v51 = vpop.f32.mrf.mxu0 }
 0x17b   :  { %v1830_v53 = vpop.f32.mrf.mxu1  ;;  %v1829_v34 = vadd.f32 %v1828_v46, %v1788_v31  ;;  %v1997_v54 = vmax.f32 %v1827_v48, 0.0  ;;  %v380_v44 = vrot.slane %v5270_v27, %v379_v37  ;;  %v384_v45 = vrot.slane %v5270_v27, %v383_v40  ;;  %v4833_v27 = vld [vmem:[#allocation5 + $0x2e8] ss:$16 sps:$4 sm:$0xff]  }
 0x17c   :  { %v1790_v55 = vpop.f32.mrf.mxu0 }
 0x17d   :  { %v1831_v32 = vpop.f32.mrf.mxu1  ;;  %v1998_v57 = vmax.f32 %v1829_v34, 0.0  ;;  %v5283_v60 = vpack.c.bf16 %v1997_v54, %v1997_v54 }
 0x17f   :  { %v2002_v35 = vpack.c.bf16 %v1998_v57, %v1998_v57 }
 0x181   :  { %2827 = vmatprep.mubr.bf16.mxu0 %v2002_v35 }
 0x182   :  { %2828 = vmatmul.mubr.bf16.vlgmr.msra.gmra.mxu0 %v5283_v60 }
 0x183   :  { %2878 = vmatpush1.bf16.msra.mxu0 %v4737_v59  ;;  %2909 = vmatprep.mubr.bf16.mxu0 %v2002_v35 }
 0x184   :  { %2879 = vmatprep.subr.bf16.mxu0 %v4742_v61 }
 0x187   :  { %2880 = vmatpush1.bf16.msra.mxu0 %v4740_v63 }
 0x188   :  { %2881 = vmatprep.subr.bf16.mxu0 %v4745_v0  ;;  %v4838_v0 = vld [vmem:[#allocation5 + $0x2cc] ss:$16 sps:$4 sm:$0xff]  }
 0x18b   :  { %2882 = vmatpush1.bf16.msra.mxu0 %v4743_v1  ;;  %v4836_v1 = vld [vmem:[#allocation5 + $0x2c8] ss:$16 sps:$4 sm:$0xff]  }
 0x18c   :  { %2883 = vmatprep.subr.bf16.mxu0 %v4748_v2  ;;  %v4841_v2 = vld [vmem:[#allocation5 + $0x2ac] ss:$16 sps:$4 sm:$0xff]  }
 0x18f   :  { %2884 = vmatpush1.bf16.msra.mxu0 %v4746_v3  ;;  %v4839_v3 = vld [vmem:[#allocation5 + $0x2a8] ss:$16 sps:$4 sm:$0xff]  }
 0x190   :  { %2885 = vmatprep.subr.bf16.mxu0 %v4751_v4  ;;  %v4844_v4 = vld [vmem:[#allocation5 + $0x28c] ss:$16 sps:$4 sm:$0xff]  }
 0x193   :  { %2886 = vmatpush1.bf16.msra.mxu0 %v4749_v5  ;;  %v4881_v5 = vld [vmem:[#allocation7 + $0x70] ss:$8 sps:$4 sm:$0xff]  }
 0x194   :  { %2887 = vmatprep.subr.bf16.mxu0 %v4754_v6  ;;  %v4883_v6 = vld [vmem:[#allocation7 + $0x74] ss:$8 sps:$4 sm:$0xff]  }
 0x197   :  { %2888 = vmatpush1.bf16.msra.mxu0 %v4752_v7  ;;  %v4886_v7 = vld [vmem:[#allocation7 + $0x64] ss:$8 sps:$4 sm:$0xff]  }
 0x198   :  { %2889 = vmatprep.subr.bf16.mxu0 %v4757_v10  ;;  %v4842_v10 = vld [vmem:[#allocation5 + $0x288] ss:$16 sps:$4 sm:$0xff]  }
 0x19b   :  { %2890 = vmatpush1.bf16.msra.mxu0 %v4755_v11  ;;  %v4884_v11 = vld [vmem:[#allocation7 + $0x60] ss:$8 sps:$4 sm:$0xff]  }
 0x19c   :  { %2891 = vmatprep.subr.bf16.mxu0 %v4760_v12  ;;  %v4847_v12 = vld [vmem:[#allocation5 + $0x26c] ss:$16 sps:$4 sm:$0xff]  }
 0x19f   :  { %2892 = vmatpush1.bf16.msra.mxu0 %v4758_v13  ;;  %v4889_v13 = vld [vmem:[#allocation7 + $0x54] ss:$8 sps:$4 sm:$0xff]  }
 0x1a0   :  { %2893 = vmatprep.subr.bf16.mxu0 %v4763_v14  ;;  %v4845_v14 = vld [vmem:[#allocation5 + $0x268] ss:$16 sps:$4 sm:$0xff]  }
 0x1a3   :  { %2894 = vmatpush2.bf16.msra.mxu0 %v4761_v15  ;;  %v4887_v15 = vld [vmem:[#allocation7 + $0x50] ss:$8 sps:$4 sm:$0xff]  }
 0x1a4   :  { %2895 = vmatprep.subr.bf16.mxu0 %v4766_v16  ;;  %v4850_v16 = vld [vmem:[#allocation5 + $0x24c] ss:$16 sps:$4 sm:$0xff]  }
 0x1a7   :  { %2896 = vmatpush2.bf16.msra.mxu0 %v4764_v17  ;;  %v4892_v17 = vld [vmem:[#allocation7 + $0x44] ss:$8 sps:$4 sm:$0xff]  }
 0x1a8   :  { %2897 = vmatprep.subr.bf16.mxu0 %v4769_v18  ;;  %v4848_v18 = vld [vmem:[#allocation5 + $0x248] ss:$16 sps:$4 sm:$0xff]  }
 0x1ab   :  { %2898 = vmatpush2.bf16.msra.mxu0 %v4767_v22  ;;  %v4890_v22 = vld [vmem:[#allocation7 + $0x40] ss:$8 sps:$4 sm:$0xff]  }
 0x1ac   :  { %2899 = vmatprep.subr.bf16.mxu0 %v4772_v23  ;;  %v4853_v23 = vld [vmem:[#allocation5 + $0x22c] ss:$16 sps:$4 sm:$0xff]  }
 0x1af   :  { %2900 = vmatpush2.bf16.msra.mxu0 %v4770_v24  ;;  %v4895_v24 = vld [vmem:[#allocation7 + $0x34] ss:$8 sps:$4 sm:$0xff]  }
 0x1b0   :  { %2901 = vmatprep.subr.bf16.mxu0 %v4775_v25  ;;  %v4851_v25 = vld [vmem:[#allocation5 + $0x228] ss:$16 sps:$4 sm:$0xff]  }
 0x1b3   :  { %2902 = vmatpush2.bf16.msra.mxu0 %v4773_v28  ;;  %v4893_v28 = vld [vmem:[#allocation7 + $0x30] ss:$8 sps:$4 sm:$0xff]  }
 0x1b4   :  { %2903 = vmatprep.subr.bf16.mxu0 %v4778_v30  ;;  %v4856_v30 = vld [vmem:[#allocation5 + $0x20c] ss:$16 sps:$4 sm:$0xff]  }
 0x1b6   :  { %v1867_v38 = vpop.f32.mrf.mxu0 }
 0x1b7   :  { %v1908_v39 = vpop.f32.mrf.mxu1  ;;  %2904 = vmatpush2.bf16.msra.mxu0 %v4776_v33  ;;  %v1868_v46 = vadd.f32 %v1867_v38, %v380_v44  ;;  %v4898_v33 = vld [vmem:[#allocation7 + $0x24] ss:$8 sps:$4 sm:$0xff]   ;;  %v4896_v38 = vld [vmem:[#allocation7 + $0x20] ss:$8 sps:$4 sm:$0xff]  }
 0x1b8   :  { %v1869_v49 = vpop.f32.mrf.mxu0  ;;  %2905 = vmatprep.subr.bf16.mxu0 %v4781_v36  ;;  %v4854_v36 = vld [vmem:[#allocation5 + $0x208] ss:$16 sps:$4 sm:$0xff]  }
 0x1b9   :  { %v1910_v9 = vpop.f32.mrf.mxu1  ;;  %v1870_v47 = vadd.f32 %v1869_v49, %v384_v45  ;;  %v1909_v48 = vadd.f32 %v1908_v39, %v1868_v46  ;;  %v4859_v39 = vld [vmem:[#allocation5 + $0x3ec] ss:$16 sps:$4 sm:$0xff]   ;;  %v4857_v49 = vld [vmem:[#allocation5 + $0x3e8] ss:$16 sps:$4 sm:$0xff]  }
 0x1ba   :  { %v1871_v41 = vpop.f32.mrf.mxu0  ;;  %v4863_v44 = vld [vmem:[#allocation5 + $0x3a8] ss:$16 sps:$4 sm:$0xff]   ;;  %v4868_v46 = vld [vmem:[#allocation5 + $0x38c] ss:$16 sps:$4 sm:$0xff]  }
 0x1bb   :  { %v1912_v20 = vpop.f32.mrf.mxu1  ;;  %2906 = vmatpush2.bf16.msra.mxu0 %v4779_v8  ;;  %v1911_v51 = vadd.f32 %v1910_v9, %v1870_v47  ;;  %v4901_v8 = vld [vmem:[#allocation7 + $0x14] ss:$8 sps:$4 sm:$0xff]   ;;  %v4899_v9 = vld [vmem:[#allocation7 + $0x10] ss:$8 sps:$4 sm:$0xff]   ;;  %v4904_v41 = vld [vmem:[#allocation7 + $0x4] ss:$8 sps:$4 sm:$0xff]  }
 0x1bc   :  { %v1872_v42 = vpop.f32.mrf.mxu0  ;;  %2907 = vmatprep.subr.bf16.mxu0 %v4784_v52  ;;  %v4862_v52 = vld [vmem:[#allocation5 + $0x3cc] ss:$16 sps:$4 sm:$0xff]   ;;  %v4860_v20 = vld [vmem:[#allocation5 + $0x3c8] ss:$16 sps:$4 sm:$0xff]  }
 0x1bd   :  { %v1913_v43 = vpop.f32.mrf.mxu1  ;;  %v4865_v42 = vld [vmem:[#allocation5 + $0x3ac] ss:$16 sps:$4 sm:$0xff]   ;;  %v4905_v45 = vld [vmem:[#allocation7 + $0xf0] ss:$8 sps:$4 sm:$0xff]  }
 0x1be   :  { %v4907_v43 = vld [vmem:[#allocation7 + $0xf4] ss:$8 sps:$4 sm:$0xff]   ;;  %v4910_v47 = vld [vmem:[#allocation7 + $0xe4] ss:$8 sps:$4 sm:$0xff]  }
 0x1bf   :  { %2908 = vmatpush2.bf16.msra.mxu0 %v4782_v21  ;;  %v4902_v21 = vld [vmem:[#allocation7] ss:$8 sps:$4 sm:$0xff]  }
 0x1c0   :  { %3363 = vmatprep.subr.bf16.mxu0 %v4883_v6 }
 0x1c2   :  { %2910 = vmatmul.mubr.bf16.vlgmr.msra.gmra.mxu0 %v5283_v60 }
 0x1c3   :  { %3364 = vmatpush1.bf16.msra.mxu0 %v4881_v5  ;;  %v4928_v5 = vld [vmem:[#allocation7 + $0x84] ss:$8 sps:$4 sm:$0xff]  }
 0x1c4   :  { %3365 = vmatprep.subr.bf16.mxu0 %v4886_v7  ;;  %v4926_v7 = vld [vmem:[#allocation7 + $0x80] ss:$8 sps:$4 sm:$0xff]  }
 0x1c7   :  { %3366 = vmatpush1.bf16.msra.mxu0 %v4884_v11  ;;  %v4929_v11 = vld [vmem:[#allocation7 + $0x170] ss:$8 sps:$4 sm:$0xff]  }
 0x1c8   :  { %3367 = vmatprep.subr.bf16.mxu0 %v4889_v13  ;;  %v4937_v13 = vld [vmem:[#allocation7 + $0x154] ss:$8 sps:$4 sm:$0xff]  }
 0x1cb   :  { %3368 = vmatpush1.bf16.msra.mxu0 %v4887_v15  ;;  %v4940_v15 = vld [vmem:[#allocation7 + $0x144] ss:$8 sps:$4 sm:$0xff]  }
 0x1cc   :  { %3369 = vmatprep.subr.bf16.mxu0 %v4892_v17  ;;  %v4943_v17 = vld [vmem:[#allocation7 + $0x134] ss:$8 sps:$4 sm:$0xff]  }
 0x1cf   :  { %3370 = vmatpush1.bf16.msra.mxu0 %v4890_v22  ;;  %v4946_v22 = vld [vmem:[#allocation7 + $0x124] ss:$8 sps:$4 sm:$0xff]  }
 0x1d0   :  { %3371 = vmatprep.subr.bf16.mxu0 %v4895_v24  ;;  %v4949_v24 = vld [vmem:[#allocation7 + $0x114] ss:$8 sps:$4 sm:$0xff]  }
 0x1d3   :  { %3372 = vmatpush1.bf16.msra.mxu0 %v4893_v28  ;;  %v4952_v28 = vld [vmem:[#allocation7 + $0x104] ss:$8 sps:$4 sm:$0xff]  }
 0x1d4   :  { %3373 = vmatprep.subr.bf16.mxu0 %v4898_v33  ;;  %v4955_v33 = vld [vmem:[#allocation7 + $0x1f4] ss:$8 sps:$4 sm:$0xff]  }
 0x1d7   :  { %3374 = vmatpush1.bf16.msra.mxu0 %v4896_v38  ;;  %v4958_v38 = vld [vmem:[#allocation7 + $0x1e4] ss:$8 sps:$4 sm:$0xff]  }
 0x1d8   :  { %3375 = vmatprep.subr.bf16.mxu0 %v4901_v8  ;;  %v4961_v8 = vld [vmem:[#allocation7 + $0x1d4] ss:$8 sps:$4 sm:$0xff]  }
 0x1db   :  { %3376 = vmatpush1.bf16.msra.mxu0 %v4899_v9  ;;  %v4964_v9 = vld [vmem:[#allocation7 + $0x1c4] ss:$8 sps:$4 sm:$0xff]  }
 0x1dc   :  { %3377 = vmatprep.subr.bf16.mxu0 %v4904_v41  ;;  %v4967_v41 = vld [vmem:[#allocation7 + $0x1b4] ss:$8 sps:$4 sm:$0xff]  }
 0x1df   :  { %3378 = vmatpush1.bf16.msra.mxu0 %v4902_v21  ;;  %v4970_v21 = vld [vmem:[#allocation7 + $0x1a4] ss:$8 sps:$4 sm:$0xff]  }
 0x1e0   :  { %3379 = vmatprep.subr.bf16.mxu0 %v4907_v43 }
 0x1e3   :  { %3380 = vmatpush2.bf16.msra.mxu0 %v4905_v45  ;;  %v4971_v45 = vld [vmem:[#allocation7 + $0x190] ss:$8 sps:$4 sm:$0xff]  }
 0x1e4   :  { %3381 = vmatprep.subr.bf16.mxu0 %v4910_v47 }
 0x1f6   :  { %v1949_v31 = vpop.f32.mrf.mxu0 }
 0x1f7   :  { %v1990_v50 = vpop.f32.mrf.mxu1  ;;  %v1950_v53 = vadd.f32 %v1949_v31, %v1909_v48  ;;  %v4866_v48 = vld [vmem:[#allocation5 + $0x388] ss:$16 sps:$4 sm:$0xff]  }
 0x1f8   :  { %v1951_v34 = vpop.f32.mrf.mxu0  ;;  %v4908_v31 = vld [vmem:[#allocation7 + $0xe0] ss:$8 sps:$4 sm:$0xff]  }
 0x1f9   :  { %v1992_v54 = vpop.f32.mrf.mxu1  ;;  %v1991_v55 = vadd.f32 %v1990_v50, %v1950_v53  ;;  %v1952_v32 = vadd.f32 %v1951_v34, %v1911_v51  ;;  %v4871_v50 = vld [vmem:[#allocation5 + $0x36c] ss:$16 sps:$4 sm:$0xff]   ;;  %v4869_v53 = vld [vmem:[#allocation5 + $0x368] ss:$16 sps:$4 sm:$0xff]   ;;  %3382 = vmatpush2.bf16.msra.mxu0 %v4908_v31 }
 0x1fa   :  { %v1953_v56 = vpop.f32.mrf.mxu0  ;;  %v4913_v51 = vld [vmem:[#allocation7 + $0xd4] ss:$8 sps:$4 sm:$0xff]   ;;  %v4911_v34 = vld [vmem:[#allocation7 + $0xd0] ss:$8 sps:$4 sm:$0xff]   ;;  %v4974_v31 = vld [vmem:[#allocation7 + $0x180] ss:$8 sps:$4 sm:$0xff]  }
 0x1fb   :  { %v1994_v57 = vpop.f32.mrf.mxu1  ;;  %v1993_v58 = vadd.f32 %v1992_v54, %v1952_v32  ;;  %v1999_v35 = vmax.f32 %v1991_v55, 0.0  ;;  %v4874_v54 = vld [vmem:[#allocation5 + $0x34c] ss:$16 sps:$4 sm:$0xff]   ;;  %3383 = vmatprep.subr.bf16.mxu0 %v4913_v51  ;;  %v4872_v32 = vld [vmem:[#allocation5 + $0x348] ss:$16 sps:$4 sm:$0xff]  }
 0x1fc   :  { %v1954_v59 = vpop.f32.mrf.mxu0  ;;  %v4916_v55 = vld [vmem:[#allocation7 + $0xc4] ss:$8 sps:$4 sm:$0xff]   ;;  %v4914_v56 = vld [vmem:[#allocation7 + $0xc0] ss:$8 sps:$4 sm:$0xff]  }
 0x1fd   :  { %v1995_v60 = vpop.f32.mrf.mxu1  ;;  %v2000_v61 = vmax.f32 %v1993_v58, 0.0  ;;  %v5295_v63 = vpack.c.bf16 %v1999_v35, %v1999_v35  ;;  %3384 = vmatpush2.bf16.msra.mxu0 %v4911_v34  ;;  %v4877_v57 = vld [vmem:[#allocation5 + $0x32c] ss:$16 sps:$4 sm:$0xff]   ;;  %v4875_v35 = vld [vmem:[#allocation5 + $0x328] ss:$16 sps:$4 sm:$0xff]  }
 0x1fe   :  { %3385 = vmatprep.subr.bf16.mxu0 %v4916_v55  ;;  %v4919_v58 = vld [vmem:[#allocation7 + $0xb4] ss:$8 sps:$4 sm:$0xff]   ;;  %v4917_v59 = vld [vmem:[#allocation7 + $0xb0] ss:$8 sps:$4 sm:$0xff]   ;;  %v2133_v51 = vld [vmem:[%s5359_s4] sm:$0xf] }
 0x1ff   :  { %v2004_v62 = vpack.c.bf16 %v2000_v61, %v2000_v61  ;;  %v4880_v60 = vld [vmem:[#allocation5 + $0x30c] ss:$16 sps:$4 sm:$0xff]   ;;  %v2142_v34 = vrot.slane %v2133_v51, %v5273_v29 }
 0x200   :  { %v4922_v61 = vld [vmem:[#allocation7 + $0xa4] ss:$8 sps:$4 sm:$0xff]  }
 0x201   :  { %2868 = vmatprep.mubr.bf16.mxu1 %v2004_v62  ;;  %3386 = vmatpush2.bf16.msra.mxu0 %v4914_v56 }
 0x202   :  { %2869 = vmatmul.mubr.bf16.vlgmr.msra.gmra.mxu1 %v5295_v63  ;;  %3387 = vmatprep.subr.bf16.mxu0 %v4919_v58 }
 0x203   :  { %2919 = vmatpush1.bf16.msra.mxu1 %v4833_v27  ;;  %2950 = vmatprep.mubr.bf16.mxu1 %v2004_v62  ;;  %v4878_v62 = vld [vmem:[#allocation5 + $0x308] ss:$16 sps:$4 sm:$0xff]  }
 0x204   :  { %2920 = vmatprep.subr.bf16.mxu1 %v4838_v0  ;;  %v4920_v27 = vld [vmem:[#allocation7 + $0xa0] ss:$8 sps:$4 sm:$0xff]  }
 0x205   :  { %3388 = vmatpush2.bf16.msra.mxu0 %v4917_v59 }
 0x206   :  { %3389 = vmatprep.subr.bf16.mxu0 %v4922_v61 }
 0x207   :  { %2921 = vmatpush1.bf16.msra.mxu1 %v4836_v1  ;;  %v4925_v1 = vld [vmem:[#allocation7 + $0x94] ss:$8 sps:$4 sm:$0xff]  }
 0x208   :  { %2922 = vmatprep.subr.bf16.mxu1 %v4841_v2 }
 0x209   :  { %3390 = vmatpush2.bf16.msra.mxu0 %v4920_v27 }
 0x20a   :  { %3391 = vmatprep.subr.bf16.mxu0 %v4925_v1  ;;  %v2146_v1 = vrot.slane %v2133_v51, %v379_v37  ;;  %v4979_v37 = vld [vmem:[#allocation8 + $0x70] sm:$0xff]  }
 0x20b   :  { %2923 = vmatpush1.bf16.msra.mxu1 %v4839_v3  ;;  %v4923_v3 = vld [vmem:[#allocation7 + $0x90] ss:$8 sps:$4 sm:$0xff]  }
 0x20c   :  { %2924 = vmatprep.subr.bf16.mxu1 %v4844_v4 }
 0x20d   :  { %3392 = vmatpush2.bf16.msra.mxu0 %v4923_v3 }
 0x20e   :  { %3393 = vmatprep.subr.bf16.mxu0 %v4928_v5 }
 0x20f   :  { %2925 = vmatpush1.bf16.msra.mxu1 %v4842_v10  ;;  %v4931_v10 = vld [vmem:[#allocation7 + $0x174] ss:$8 sps:$4 sm:$0xff]  }
 0x210   :  { %2926 = vmatprep.subr.bf16.mxu1 %v4847_v12  ;;  %v4934_v12 = vld [vmem:[#allocation7 + $0x164] ss:$8 sps:$4 sm:$0xff]  }
 0x211   :  { %3394 = vmatpush2.bf16.msra.mxu0 %v4926_v7 }
 0x213   :  { %2927 = vmatpush1.bf16.msra.mxu1 %v4845_v14  ;;  %v4935_v14 = vld [vmem:[#allocation7 + $0x150] ss:$8 sps:$4 sm:$0xff]  }
 0x214   :  { %2928 = vmatprep.subr.bf16.mxu1 %v4850_v16  ;;  %v4938_v16 = vld [vmem:[#allocation7 + $0x140] ss:$8 sps:$4 sm:$0xff]  }
 0x217   :  { %2929 = vmatpush1.bf16.msra.mxu1 %v4848_v18  ;;  %v4941_v18 = vld [vmem:[#allocation7 + $0x130] ss:$8 sps:$4 sm:$0xff]  }
 0x218   :  { %2930 = vmatprep.subr.bf16.mxu1 %v4853_v23  ;;  %v4944_v23 = vld [vmem:[#allocation7 + $0x120] ss:$8 sps:$4 sm:$0xff]  }
 0x21b   :  { %2931 = vmatpush1.bf16.msra.mxu1 %v4851_v25  ;;  %v4947_v25 = vld [vmem:[#allocation7 + $0x110] ss:$8 sps:$4 sm:$0xff]  }
 0x21c   :  { %2932 = vmatprep.subr.bf16.mxu1 %v4856_v30  ;;  %v4950_v30 = vld [vmem:[#allocation7 + $0x100] ss:$8 sps:$4 sm:$0xff]  }
 0x21f   :  { %2933 = vmatpush1.bf16.msra.mxu1 %v4854_v36  ;;  %v4953_v36 = vld [vmem:[#allocation7 + $0x1f0] ss:$8 sps:$4 sm:$0xff]  }
 0x220   :  { %2934 = vmatprep.subr.bf16.mxu1 %v4859_v39  ;;  %v4956_v39 = vld [vmem:[#allocation7 + $0x1e0] ss:$8 sps:$4 sm:$0xff]  }
 0x223   :  { %2935 = vmatpush2.bf16.msra.mxu1 %v4857_v49  ;;  %v4959_v49 = vld [vmem:[#allocation7 + $0x1d0] ss:$8 sps:$4 sm:$0xff]  }
 0x224   :  { %2936 = vmatprep.subr.bf16.mxu1 %v4862_v52  ;;  %v4962_v52 = vld [vmem:[#allocation7 + $0x1c0] ss:$8 sps:$4 sm:$0xff]  }
 0x227   :  { %2937 = vmatpush2.bf16.msra.mxu1 %v4860_v20  ;;  %v4965_v20 = vld [vmem:[#allocation7 + $0x1b0] ss:$8 sps:$4 sm:$0xff]  }
 0x228   :  { %2938 = vmatprep.subr.bf16.mxu1 %v4865_v42  ;;  %v4968_v42 = vld [vmem:[#allocation7 + $0x1a0] ss:$8 sps:$4 sm:$0xff]  }
 0x22b   :  { %2939 = vmatpush2.bf16.msra.mxu1 %v4863_v44  ;;  %v4973_v44 = vld [vmem:[#allocation7 + $0x194] ss:$8 sps:$4 sm:$0xff]  }
 0x22c   :  { %2940 = vmatprep.subr.bf16.mxu1 %v4868_v46 }
 0x22f   :  { %2941 = vmatpush2.bf16.msra.mxu1 %v4866_v48  ;;  %v4976_v48 = vld [vmem:[#allocation7 + $0x184] ss:$8 sps:$4 sm:$0xff]  }
 0x230   :  { %2942 = vmatprep.subr.bf16.mxu1 %v4871_v50 }
 0x233   :  { %2943 = vmatpush2.bf16.msra.mxu1 %v4869_v53  ;;  %v2138_v53 = vrot.slane %v2133_v51, %v5265_v26 }
 0x234   :  { %2944 = vmatprep.subr.bf16.mxu1 %v4874_v54 }
 0x237   :  { %2945 = vmatpush2.bf16.msra.mxu1 %v4872_v32 }
 0x238   :  { %2946 = vmatprep.subr.bf16.mxu1 %v4877_v57 }
 0x23b   :  { %2947 = vmatpush2.bf16.msra.mxu1 %v4875_v35 }
 0x23c   :  { %2948 = vmatprep.subr.bf16.mxu1 %v4880_v60 }
 0x23f   :  { %2949 = vmatpush2.bf16.msra.mxu1 %v4878_v62 }
 0x240   :  { %3404 = vmatprep.subr.bf16.mxu1 %v4931_v10 }
 0x242   :  { %2951 = vmatmul.mubr.bf16.vlgmr.msra.gmra.mxu1 %v5295_v63  ;;  %v5299_v0 = vpop.f32.mrf.mxu0  ;;  %v4932_v63 = vld [vmem:[#allocation7 + $0x160] ss:$8 sps:$4 sm:$0xff]  }
 0x243   :  { %3405 = vmatpush1.bf16.msra.mxu1 %v4929_v11  ;;  %v2830_v54 = vadd.f32 %v5299_v0, %v2138_v53  ;;  %v2150_v0 = vrot.slane %v2133_v51, %v383_v40  ;;  %v4981_v40 = vld [vmem:[#allocation8 + $0x68] sm:$0xff]  }
 0x244   :  { %v5301_v2 = vpop.f32.mrf.mxu0  ;;  %3406 = vmatprep.subr.bf16.mxu1 %v4934_v12 }
 0x245   :  { %v2832_v32 = vadd.f32 %v5301_v2, %v2142_v34 }
 0x246   :  { %v2833_v4 = vpop.f32.mrf.mxu0 }
 0x247   :  { %3407 = vmatpush1.bf16.msra.mxu1 %v4932_v63 }
 0x248   :  { %v2834_v6 = vpop.f32.mrf.mxu0  ;;  %3408 = vmatprep.subr.bf16.mxu1 %v4937_v13 }
 0x24b   :  { %3409 = vmatpush1.bf16.msra.mxu1 %v4935_v14 }
 0x24c   :  { %3410 = vmatprep.subr.bf16.mxu1 %v4940_v15  ;;  %v4977_v15 = vld [vmem:[#allocation8 + $0x78] sm:$0xff]  }
 0x24d   :  { %4241 = vmatprep.subr.bf16.mxu0 %v4977_v15 }
 0x24f   :  { %3411 = vmatpush1.bf16.msra.mxu1 %v4938_v16  ;;  %v4978_v16 = vld [vmem:[#allocation8 + $0x38] sm:$0xff]  }
 0x250   :  { %3412 = vmatprep.subr.bf16.mxu1 %v4943_v17  ;;  %v4982_v17 = vld [vmem:[#allocation8 + $0x28] sm:$0xff]  }
 0x253   :  { %3413 = vmatpush1.bf16.msra.mxu1 %v4941_v18  ;;  %v4983_v18 = vld [vmem:[#allocation8 + $0x60] sm:$0xff]  }
 0x254   :  { %3414 = vmatprep.subr.bf16.mxu1 %v4946_v22  ;;  %v4984_v22 = vld [vmem:[#allocation8 + $0x20] sm:$0xff]  }
 0x257   :  { %3415 = vmatpush1.bf16.msra.mxu1 %v4944_v23  ;;  %v4985_v23 = vld [vmem:[#allocation8 + $0x58] sm:$0xff]  }
 0x258   :  { %3416 = vmatprep.subr.bf16.mxu1 %v4949_v24  ;;  %v4986_v24 = vld [vmem:[#allocation8 + $0x18] sm:$0xff]  }
 0x25b   :  { %3417 = vmatpush1.bf16.msra.mxu1 %v4947_v25  ;;  %v4987_v25 = vld [vmem:[#allocation8 + $0x50] sm:$0xff]  }
 0x25c   :  { %3418 = vmatprep.subr.bf16.mxu1 %v4952_v28  ;;  %v4988_v28 = vld [vmem:[#allocation8 + $0x10] sm:$0xff]  }
 0x25f   :  { %3419 = vmatpush1.bf16.msra.mxu1 %v4950_v30  ;;  %v4989_v30 = vld [vmem:[#allocation8 + $0x48] sm:$0xff]  }
 0x260   :  { %3420 = vmatprep.subr.bf16.mxu1 %v4955_v33  ;;  %v4990_v33 = vld [vmem:[#allocation8 + $0x8] sm:$0xff]  }
 0x263   :  { %3421 = vmatpush2.bf16.msra.mxu1 %v4953_v36  ;;  %v4991_v36 = vld [vmem:[#allocation8 + $0x40] sm:$0xff]  }
 0x264   :  { %3422 = vmatprep.subr.bf16.mxu1 %v4958_v38  ;;  %v4992_v38 = vld [vmem:[#allocation8] sm:$0xff]  }
 0x267   :  { %3423 = vmatpush2.bf16.msra.mxu1 %v4956_v39  ;;  %v4993_v39 = vld [vmem:[%s5364_s9 + $0x38] sm:$0xff]  }
 0x268   :  { %3424 = vmatprep.subr.bf16.mxu1 %v4961_v8  ;;  %v5123_v8 = vmov 0.0  }
 0x26b   :  { %3425 = vmatpush2.bf16.msra.mxu1 %v4959_v49  ;;  %v4994_v49 = vld [vmem:[%s5364_s9 + $0x30] sm:$0xff]  }
 0x26c   :  { %3426 = vmatprep.subr.bf16.mxu1 %v4964_v9  ;;  %v4995_v9 = vld [vmem:[%s5364_s9 + $0x28] sm:$0xff]  }
 0x26f   :  { %3427 = vmatpush2.bf16.msra.mxu1 %v4962_v52  ;;  %v4996_v52 = vld [vmem:[%s5364_s9 + $0x20] sm:$0xff]  }
 0x270   :  { %3428 = vmatprep.subr.bf16.mxu1 %v4967_v41  ;;  %v4997_v41 = vld [vmem:[%s5364_s9 + $0x18] sm:$0xff]  }
 0x273   :  { %3429 = vmatpush2.bf16.msra.mxu1 %v4965_v20 }
 0x274   :  { %3430 = vmatprep.subr.bf16.mxu1 %v4970_v21 }
 0x277   :  { %3431 = vmatpush2.bf16.msra.mxu1 %v4968_v42 }
 0x278   :  { %3432 = vmatprep.subr.bf16.mxu1 %v4973_v44  ;;  %v3031_v44 = vld [vmem:[%s5361_s6] sm:$0x3] }
 0x27b   :  { %3433 = vmatpush2.bf16.msra.mxu1 %v4971_v45  ;;  %v3036_v45 = vrot.slane %v3031_v44, %v5265_v26  ;;  %v4998_v26 = vld [vmem:[%s5364_s9 + $0x10] sm:$0xff]  }
 0x27c   :  { %3434 = vmatprep.subr.bf16.mxu1 %v4976_v48 }
 0x27f   :  { %3435 = vmatpush2.bf16.msra.mxu1 %v4974_v31 }
 0x280   :  { %4272 = vmatprep.subr.bf16.mxu1 %v5123_v8 }
 0x282   :  { %v2911_v43 = vpop.f32.mrf.mxu0 }
 0x283   :  { %v2912_v3 = vadd.f32 %v2911_v43, %v2146_v1 }
 0x284   :  { %v2913_v46 = vpop.f32.mrf.mxu0 }
 0x285   :  { %v2914_v2 = vadd.f32 %v2913_v46, %v2150_v0  ;;  %v3040_v46 = vrot.slane %v3031_v44, %v5273_v29  ;;  %v4999_v29 = vld [vmem:[%s5364_s9 + $0x8] sm:$0xff]  }
 0x286   :  { %v2915_v47 = vpop.f32.mrf.mxu0 }
 0x288   :  { %v2916_v50 = vpop.f32.mrf.mxu0 }
 0x2c2   :  { %v2870_v55 = vpop.f32.mrf.mxu1 }
 0x2c3   :  { %v2871_v56 = vadd.f32 %v2870_v55, %v2830_v54 }
 0x2c4   :  { %v2872_v57 = vpop.f32.mrf.mxu1 }
 0x2c5   :  { %v2873_v58 = vadd.f32 %v2872_v57, %v2832_v32  ;;  %v2959_v35 = vmax.f32 %v2871_v56, 0.0 }
 0x2c6   :  { %v2874_v59 = vpop.f32.mrf.mxu1 }
 0x2c7   :  { %v2960_v60 = vmax.f32 %v2873_v58, 0.0  ;;  %v2963_v27 = vpack.c.bf16 %v2959_v35, %v2959_v35  ;;  %v5000_v58 = vld [vmem:[%s5364_s9] sm:$0xff]  }
 0x2c8   :  { %v2875_v61 = vpop.f32.mrf.mxu1  ;;  %v4215_v59 = vld [vmem:[%s5363_s8] ss:$0 sm:$0xff]  ;;  %s5125_s8 = smov [#allocation10]  }
 0x2c9   :  { %v2964_v62 = vpack.c.bf16 %v2960_v60, %v2960_v60  ;;  %s3756_s9 = sshll.u32 %s5125_s8, 4  ;;  %s3757_s9 = int_to_ptr.vmem [resolvable:$true] %s3756_s9 }
 0x2ca   :  { %p5090_p7 = scmp.lt.s32.totalorder %s3757_s9, %s3757_s9 }
 0x2cb   :  { %3395 = vmatprep.mubr.bf16.mxu0 %v2964_v62 }
 0x2cc   :  { %3396 = vmatmul.mubr.bf16.vlgmr.msra.gmra.mxu0 %v2963_v27 }
 0x2cd   :  { %4242 = vmatpush3.bf16.msra.mxu0 %v4978_v16 }
 0x2ce   :  { %4243 = vmatprep.subr.bf16.mxu0 %v4979_v37 }
 0x2d1   :  { %4244 = vmatpush3.bf16.msra.mxu0 %v4980_v19 }
 0x2d2   :  { %4245 = vmatprep.subr.bf16.mxu0 %v4981_v40 }
 0x2d5   :  { %4246 = vmatpush3.bf16.msra.mxu0 %v4982_v17 }
 0x2d6   :  { %4247 = vmatprep.subr.bf16.mxu0 %v4983_v18 }
 0x2d9   :  { %4248 = vmatpush3.bf16.msra.mxu0 %v4984_v22 }
 0x2da   :  { %4249 = vmatprep.subr.bf16.mxu0 %v4985_v23 }
 0x2dd   :  { %4250 = vmatpush3.bf16.msra.mxu0 %v4986_v24 }
 0x2de   :  { %4251 = vmatprep.subr.bf16.mxu0 %v4987_v25 }
 0x2e1   :  { %4252 = vmatpush3.bf16.msra.mxu0 %v4988_v28 }
 0x2e2   :  { %4253 = vmatprep.subr.bf16.mxu0 %v4989_v30 }
 0x2e5   :  { %4254 = vmatpush3.bf16.msra.mxu0 %v4990_v33 }
 0x2e6   :  { %4255 = vmatprep.subr.bf16.mxu0 %v4991_v36 }
 0x2e9   :  { %4256 = vmatpush3.bf16.msra.mxu0 %v4992_v38 }
 0x302   :  { %v2952_v4 = vpop.f32.mrf.mxu1 }
 0x303   :  { %v2953_v5 = vadd.f32 %v2952_v4, %v2912_v3  ;;  %v4232_v4 = vld [vmem:[%s5365_s10] ss:$0 sm:$0xff]  ;;  %s5085_s10 = scalar_lea.vmem %s3757_s9, 128 }
 0x304   :  { %v2954_v6 = vpop.f32.mrf.mxu1  ;;  %p5086_p6 = scmp.ne.s32.totalorder %s3757_s9, %s5085_s10  ;;  %p5091_p8 = scmp.lt.s32.totalorder %s5085_s10, %s5085_s10 }
 0x305   :  { %v2955_v7 = vadd.f32 %v2954_v6, %v2914_v2  ;;  %v2961_v10 = vmax.f32 %v2953_v5, 0.0 }
 0x306   :  { %v2956_v11 = vpop.f32.mrf.mxu1  ;;  %p5092_p9 = por %p5091_p8, %p5090_p7 }
 0x307   :  { %v2962_v12 = vmax.f32 %v2955_v7, 0.0  ;;  %v2965_v14 = vpack.c.bf16 %v2961_v10, %v2961_v10 }
 0x308   :  { %v2957_v63 = vpop.f32.mrf.mxu1  ;;  %p5093_p10 = pnand %p5092_p9, %p5086_p6 }
 0x309   :  { %v2966_v13 = vpack.c.bf16 %v2962_v12, %v2962_v12 }
 0x30b   :  { %3436 = vmatprep.mubr.bf16.mxu1 %v2966_v13 }
 0x30c   :  { %3437 = vmatmul.mubr.bf16.vlgmr.msra.gmra.mxu1 %v2965_v14 }
 0x30d   :  { %4273 = vmatpush3.bf16.msra.mxu1 %v4993_v39  ;;  %4288 = vmatprep.mubr.msk.bf16.mxu1 %vm5124_vm0, %v5123_v8 }
 0x30e   :  { %4274 = vmatprep.subr.bf16.mxu1 %v5123_v8 }
 0x311   :  { %4275 = vmatpush3.bf16.msra.mxu1 %v4994_v49 }
 0x312   :  { %4276 = vmatprep.subr.bf16.mxu1 %v5123_v8 }
 0x315   :  { %4277 = vmatpush3.bf16.msra.mxu1 %v4995_v9 }
 0x316   :  { %4278 = vmatprep.subr.bf16.mxu1 %v5123_v8 }
 0x319   :  { %4279 = vmatpush3.bf16.msra.mxu1 %v4996_v52 }
 0x31a   :  { %4280 = vmatprep.subr.bf16.mxu1 %v5123_v8 }
 0x31d   :  { %4281 = vmatpush3.bf16.msra.mxu1 %v4997_v41 }
 0x31e   :  { %4282 = vmatprep.subr.bf16.mxu1 %v5123_v8 }
 0x321   :  { %4283 = vmatpush3.bf16.msra.mxu1 %v4998_v26 }
 0x322   :  { %4284 = vmatprep.subr.bf16.mxu1 %v5123_v8 }
 0x325   :  { %4285 = vmatpush3.bf16.msra.mxu1 %v4999_v29 }
 0x326   :  { %4286 = vmatprep.subr.bf16.mxu1 %v5123_v8 }
 0x329   :  { %4287 = vmatpush3.bf16.msra.mxu1 %v5000_v58 }
 0x38c   :  { %v3397_v20 = vpop.f32.mrf.mxu0 }
 0x38d   :  { %v3398_v47 = vadd.f32 %v3397_v20, %v3036_v45 }
 0x38e   :  { %v3399_v21 = vpop.f32.mrf.mxu0 }
 0x38f   :  { %v3400_v31 = vadd.f32 %v3399_v21, %v3040_v46 }
 0x390   :  { %v3401_v42 = vpop.f32.mrf.mxu0 }
 0x392   :  { %v3402_v43 = vpop.f32.mrf.mxu0 }
 0x3cc   :  { %v3438_v48 = vpop.f32.mrf.mxu1 }
 0x3cd   :  { %v3439_v50 = vadd.f32 %v3438_v48, %v3398_v47 }
 0x3ce   :  { %v3440_v51 = vpop.f32.mrf.mxu1 }
 0x3cf   :  { %v3441_v53 = vadd.f32 %v3440_v51, %v3400_v31  ;;  %v3445_v34 = vmax.f32 %v3439_v50, 0.0 }
 0x3d0   :  { %v3442_v54 = vpop.f32.mrf.mxu1 }
 0x3d1   :  { %v3446_v55 = vmax.f32 %v3441_v53, 0.0  ;;  %v3447_v57 = vpack.c.bf16 %v3445_v34, %v3445_v34 }
 0x3d2   :  { %v3443_v32 = vpop.f32.mrf.mxu1 }
 0x3d3   :  { %v3448_v56 = vpack.c.bf16 %v3446_v55, %v3446_v55 }
 0x3d5   :  { %3616 = vmatprep.mubr.bf16.mxu0 %v3448_v56 }
 0x3d6   :  { %3617 = vmatmul.mubr.bf16.vlgmr.msra.gmra.mxu0 %v3447_v57 }
 0x496   :  { %v4257_v35 = vpop.f32.mrf.mxu0 }
 0x498   :  { %v4258_v60 = vpop.f32.mrf.mxu0 }
 0x499   :  { %v4259_v61 = vadd.f32 %v4258_v60, %v4257_v35 }
 0x49a   :  { %v4260_v62 = vpop.f32.mrf.mxu0 }
 0x49b   :  { %v3619_v27 = vadd.f32 %v4259_v61, %v4215_v59 }
 0x49c   :  { %v4261_v1 = vpop.f32.mrf.mxu0 }
 0x49d   :  { %v3624_v0 = vmax.f32 %v3619_v27, 0.0 }
 0x49f   :  { %v3625_v3 = vpack.c.bf16 %v3624_v0, %v3624_v0 }
 0x4a1   :  { %4289 = vmatmul.mubr.bf16.vlgmr.msra.gmra.mxu1 %v3625_v3 }
 0x561   :  { %v3731_v2 = vpop.f32.mrf.mxu1 }
 0x562   :  { %v3732_v5 = vadd.f32 %v4232_v4, %v3731_v2 }
 0x563   :  { %v4290_v6 = vpop.f32.mrf.mxu1 }
 0x564   :  { %v3738_v7 = vsel %vm3737_vm1, %v3732_v5, -inf }
 0x565   :  { %3739 = vmax.xlane.f32.xlu0 %v3738_v7  ;;  %v3734_v10 = vpop.f32.mrf.mxu1 }
 0x567   :  { %v4291_v11 = vpop.f32.mrf.mxu1 }
 0x5ee   :  { %v3740_v12 = vpop.xlane.xlu0 %3739 }
 0x5ef   :  { %v3741_v63 = vsub.f32 %v3732_v5, %v3740_v12 }
 0x5f1   :  { %v3742_v13 = vmul.f32 1.442695, %v3741_v63 }
 0x5f3   :  { %5001 = vpow2.f32 %v3742_v13 }
 0x600   :  { %v5002_v14 = vpop.eup %5001 }
 0x601   :  { %v3744_v15 = vsel %vm3737_vm1, %v5002_v14, 0.0 }
 0x602   :  { %3745 = vadd.xlane.f32.xlu0 %v3744_v15 }
 0x68b   :  { %v3746_v16 = vpop.xlane.xlu0 %3745 }
 0x68c   :  { %5003 = vrcp.f32 %v3746_v16 }
 0x699   :  { %v5004_v37 = vpop.eup %5003 }
 0x69a   :  { %v3748_v19 = vmul.f32 %v5004_v37, %v5002_v14 }
 0x69c   :  { %3749 = vst.msk [vmem:[#allocation10] sm:$0xff] %vm3737_vm1, %v3748_v19 }
 0x69d   :  { %5096 = shalt.err (!%p5093_p10)
}
 0x69e   :  { %3759 = dma.vmem_to_hbm [thread:$0]  %s3757_s9, 128, %s5366_s11, [#allocation4]  }
 0x69f   :  { %5111 = dma.done.wait [#allocation4], 128  }
 0x6a0   :  { %5112 = vsyncadd [#allocation4], 4294967168 }
 0x6a1   :  { %3763 = vsyncpa [#allocation3], 1 }
 0x6a2   :  { %3764 = vsyncpa [#allocation6], 1 }
 0x6a3   :  { %3765 = vsyncpa [#allocation9], 1 }
 0x6a4   :  { %3766 = vsyncpa [#allocation4], 1 }

</bundles_post_ra>
